<compile_context>
chip_gen: v7x
topology: tpu7x:2x2x1
jax: 0.10.0
libtpu: 0.0.40
codegen_flags: <defaults>
</compile_context>

<pallas_src>
import math

import numpy as np
import jax
import jax.numpy as jnp
from jax import lax
from jax.experimental import pallas as pl
from jax.experimental.pallas import tpu as pltpu


def _round_up(n, m):
    return ((n + m - 1) // m) * m


def _ceil_div(a, b):
    return -(-a // b)


# --------------------------------------------------------------------------
# WaveNet residual stack kernel (one (batch, time-chunk) window per step)
# --------------------------------------------------------------------------
def make_wavenet_kernel(num_layers, kernel_size, c_in, c_out,
                        halo, chunk, n_chunks):
    """Kernel over one (C_in, halo + chunk) window.

    Refs:
      xw_ref  : (1, C_in, W)           window = halo of history + chunk (f32)
      wcg_ref : (L, 2*C_out, K*C_in)   fused filter+gate conv weights (bf16)
      bcg_ref : (L, 2*C_out, 1)        fused filter+gate biases       (f32)
      wrs_ref : (L, 2*C_in, C_out)     fused residual+skip 1x1 weights (bf16)
      brs_ref : (L, 2*C_in, 1)         fused residual+skip biases     (f32)
      out_ref : (1, C_in, chunk)       sum of skip connections (chunk cols)
    """
    W = halo + chunk

    def kernel(xw_ref, wcg_ref, bcg_ref, wrs_ref, brs_ref, out_ref):
        h = xw_ref[0]                                    # (C_in, W) f32

        # First chunk of each batch: window positions left of `pad_end` are
        # the causal zero padding.  Intermediate activations there must be
        # re-zeroed once per layer (the residual bias makes them nonzero);
        # for later chunks pad_end <= 0 and the mask is a no-op.
        if n_chunks > 1:
            j = pl.program_id(0) % n_chunks
        else:
            j = 0
        pad_end = halo - j * chunk
        in_pad = lax.broadcasted_iota(jnp.int32, (c_in, W), 1) < pad_end

        skip_sum = None
        for l in range(num_layers):                      # static unroll
            d = 2 ** l
            # Stack the K dilated taps along channels -> ONE MXU matmul per
            # layer with a K*C_in-deep contraction.  Rolls go to the XLU; the
            # wrapped garbage only lives left of the halo and never reaches
            # the output columns (halo >= receptive field).
            parts = []
            for k in range(kernel_size):
                shift = (kernel_size - 1 - k) * d
                parts.append(h if shift == 0 else pltpu.roll(h, shift, axis=1))
            xs = jnp.concatenate(parts, axis=0).astype(jnp.bfloat16)

            fg = jnp.dot(wcg_ref[l], xs,
                         preferred_element_type=jnp.float32) + bcg_ref[l]
            f = fg[:c_out]
            g = fg[c_out:]
            # sigmoid(g) = 0.5*(tanh(g/2)+1): 2 EUP tanh, no exp + divide.
            gated = jnp.tanh(f) * (0.5 * (jnp.tanh(0.5 * g) + 1.0))

            rs = jnp.dot(wrs_ref[l], gated.astype(jnp.bfloat16),
                         preferred_element_type=jnp.float32) + brs_ref[l]
            res = rs[:c_in]
            skip = rs[c_in:]

            skip_sum = skip if skip_sum is None else skip_sum + skip
            if l + 1 < num_layers:
                h = jnp.where(in_pad, 0.0, h + res)      # causal-pad cleanup

        out_ref[0] = skip_sum[:, halo:].astype(out_ref.dtype)

    return kernel


def wavenet_skip_sum(x, params, kernel_size):
    """Runs the residual stack; returns sum(skip) with shape (B, C, T)."""
    B, C, T = x.shape
    L, K, c_out, c_in = params["wc"].shape
    assert c_in == C and K == kernel_size

    rf = (K - 1) * (2 ** L - 1)                   # receptive field (history)
    halo = _round_up(max(rf, 1), 128)             # lane-aligned halo
    chunk = min(_round_up(T, 128), 512)           # lane-dense output chunks
    n_chunks = _ceil_div(T, chunk)
    t_pad = n_chunks * chunk
    W = halo + chunk

    # Fuse filter+gate convs (all K taps) and residual+skip 1x1 convs so each
    # layer is exactly two MXU matmuls.  Matmul operands stored in bf16.
    wcg = jnp.concatenate([params["wc"], params["wg"]], axis=2)   # (L,K,2Co,Ci)
    wcg = jnp.transpose(wcg, (0, 2, 1, 3)).reshape(L, 2 * c_out, K * c_in)
    wcg = wcg.astype(jnp.bfloat16)
    bcg = jnp.concatenate([params["bc"], params["bg"]], axis=1)   # (L,2Co,1)
    wrs = jnp.concatenate([params["wr"], params["ws"]], axis=1)   # (L,2Ci,Co)
    wrs = wrs.astype(jnp.bfloat16)
    brs = jnp.concatenate([params["br"], params["bs"]], axis=1)   # (L,2Ci,1)

    # Overlapping (halo + chunk) windows built host-side so every grid step is
    # a rectangular, independent block ('parallel' -> pipelined + dual-TC).
    x_pad = jnp.pad(x, ((0, 0), (0, 0), (halo, t_pad - T)))
    idx = (np.arange(n_chunks, dtype=np.int32)[:, None] * chunk
           + np.arange(W, dtype=np.int32)[None, :])
    xw = jnp.take(x_pad, jnp.asarray(idx), axis=2)                # (B,C,nc,W)
    xw = jnp.transpose(xw, (0, 2, 1, 3)).reshape(B * n_chunks, C, W)

    n_win = B * n_chunks
    flops = 2 * n_win * L * W * (2 * c_out * K * c_in + 2 * c_in * c_out)
    transc = 2 * n_win * L * W * c_out
    bytes_acc = (xw.size * 4 + n_win * C * chunk * 4
                 + (wcg.size + wrs.size) * 2 + (bcg.size + brs.size) * 4)

    kern = make_wavenet_kernel(L, K, c_in, c_out, halo, chunk, n_chunks)
    out = pl.pallas_call(
        kern,
        out_shape=jax.ShapeDtypeStruct((n_win, C, chunk), jnp.float32),
        grid=(n_win,),
        in_specs=[
            pl.BlockSpec((1, C, W), lambda i: (i, 0, 0)),
            pl.BlockSpec((L, 2 * c_out, K * c_in), lambda i: (0, 0, 0)),
            pl.BlockSpec((L, 2 * c_out, 1), lambda i: (0, 0, 0)),
            pl.BlockSpec((L, 2 * c_in, c_out), lambda i: (0, 0, 0)),
            pl.BlockSpec((L, 2 * c_in, 1), lambda i: (0, 0, 0)),
        ],
        out_specs=pl.BlockSpec((1, C, chunk), lambda i: (i, 0, 0)),
        compiler_params=pltpu.CompilerParams(
            dimension_semantics=("parallel",),
            vmem_limit_bytes=48 * 1024 * 1024),
        cost_estimate=pl.CostEstimate(flops=int(flops),
                                      transcendentals=int(transc),
                                      bytes_accessed=int(bytes_acc)),
    )(xw, wcg, bcg, wrs, brs)

    out = out.reshape(B, n_chunks, C, chunk)
    out = jnp.transpose(out, (0, 2, 1, 3)).reshape(B, C, t_pad)
    return out[:, :, :T]


# --------------------------------------------------------------------------
# torchaudio-style sinc resampler (hann window) as a banded polyphase matmul
# --------------------------------------------------------------------------
def _sinc_resample_kernel_np(orig, new, lowpass_filter_width=6, rolloff=0.99):
    """torchaudio sinc_interp_hann polyphase kernel (numpy, host-side)."""
    base_freq = min(orig, new) * rolloff
    width = int(math.ceil(lowpass_filter_width * orig / base_freq))
    idx = np.arange(-width, width + orig, dtype=np.float64) / orig
    t = (np.arange(0, -new, -1, dtype=np.float64) / new)[:, None] + idx[None, :]
    t = t * base_freq
    t = np.clip(t, -lowpass_filter_width, lowpass_filter_width)
    window = np.cos(t * np.pi / lowpass_filter_width / 2.0) ** 2
    t = t * np.pi
    scale = base_freq / orig
    kernel = np.where(t == 0, 1.0, np.sin(t) / np.where(t == 0, 1.0, t))
    kernel = kernel * window * scale
    return kernel.astype(np.float32), width              # (new, 2*width+orig)


def _resample_band_setup(orig, new):
    """Polyphase band slab + tiling geometry for  out = y_pad @ W_band."""
    kmat, width = _sinc_resample_kernel_np(orig, new)
    Kw = kmat.shape[1]

    # Output block width: multiple of 128 lanes AND of `new` (each block starts
    # at a fresh polyphase frame) AND such that the per-block input-column
    # advance is a multiple of the 128-wide contraction tile.
    base = 128 * new // math.gcd(128, new)
    mult = 1
    while ((mult * base // new) * orig) % 128 != 0:
        mult += 1
        assert mult <= 256, "could not align resample band tiling"
    to_blk = mult * base
    frames_per_blk = to_blk // new
    off_cols = frames_per_blk * orig          # input cols advanced per j block
    tk = 128                                  # contraction tile (lane-aligned)
    band_h = (frames_per_blk - 1) * orig + Kw
    band_h_pad = _round_up(band_h, tk)

    w_band = np.zeros((band_h_pad, to_blk), np.float32)
    for fl in range(frames_per_blk):
        r0 = fl * orig
        c0 = fl * new
        w_band[r0:r0 + Kw, c0:c0 + new] = kmat.T
    return w_band, width, to_blk, off_cols, band_h_pad, tk


def _resample_matmul_kernel(y_ref, w_ref, o_ref, acc_ref):
    @pl.when(pl.program_id(2) == 0)
    def _():
        acc_ref[...] = jnp.zeros_like(acc_ref)
    acc_ref[...] += jnp.dot(y_ref[...], w_ref[...],
                            preferred_element_type=jnp.float32)
    @pl.when(pl.program_id(2) == pl.num_programs(2) - 1)
    def _():
        o_ref[...] = acc_ref[...]


def resample_rows(rows, orig_sr, new_sr):
    """Resample each row of (R, T) along time.  Returns (R, T_out) f32."""
    g = math.gcd(orig_sr, new_sr)
    orig, new = orig_sr // g, new_sr // g
    if orig == new:
        return rows
    R, T = rows.shape
    t_out = _ceil_div(new * T, orig)

    w_band, width, to_blk, off_cols, band_h_pad, tk = \
        _resample_band_setup(orig, new)
    t_out_pad = _round_up(t_out, to_blk)
    n_j = t_out_pad // to_blk
    n_k = band_h_pad // tk
    blocks_per_j = off_cols // tk

    # MXU M dim: keep all R rows in one tile when possible (don't shrink < R).
    rb = min(_round_up(R, 8), 256)
    r_pad = _round_up(R, rb)

    total_cols = (n_j - 1) * off_cols + band_h_pad
    right = max(total_cols - width - T, 0)
    y_pad = jnp.pad(rows, ((0, r_pad - R), (width, right)))[:, :total_cols]
    y_pad = y_pad.astype(jnp.bfloat16)
    w_b = jnp.asarray(w_band, jnp.bfloat16)

    flops = 2 * r_pad * t_out_pad * band_h_pad
    bytes_acc = ((r_pad // rb) * n_j * n_k * (rb * tk + tk * to_blk) * 2
                 + r_pad * t_out_pad * 4)

    out = pl.pallas_call(
        _resample_matmul_kernel,
        out_shape=jax.ShapeDtypeStruct((r_pad, t_out_pad), jnp.float32),
        grid=(r_pad // rb, n_j, n_k),
        in_specs=[
            pl.BlockSpec((rb, tk),
                         lambda i, j, k: (i, j * blocks_per_j + k)),
            pl.BlockSpec((tk, to_blk), lambda i, j, k: (k, 0)),
        ],
        out_specs=pl.BlockSpec((rb, to_blk), lambda i, j, k: (i, j)),
        scratch_shapes=[pltpu.VMEM((rb, to_blk), jnp.float32)],
        compiler_params=pltpu.CompilerParams(
            dimension_semantics=("parallel", "parallel", "arbitrary"),
            vmem_limit_bytes=48 * 1024 * 1024),
        cost_estimate=pl.CostEstimate(flops=int(flops), transcendentals=0,
                                      bytes_accessed=int(bytes_acc)),
    )(y_pad, w_b)
    return out[:R, :t_out]


def wavenet_decoder_forward(x, params, kernel_size, tgt_token_rate, sample_rate):
    B, C, T = x.shape
    skip = wavenet_skip_sum(x, params, kernel_size)      # (B, C, T)
    rows = skip.reshape(B * C, T)
    out_rows = resample_rows(rows, tgt_token_rate, sample_rate)
    t_out = out_rows.shape[1]
    return out_rows.reshape(B, C, t_out)                 # (B, C, T_out)


# --------------------------------------------------------------------------
# Plain-JAX reference (mirrors the PyTorch module semantics, pure f32)
# --------------------------------------------------------------------------
def reference_forward(x, params, kernel_size, orig_sr, new_sr):
    L = params["wc"].shape[0]
    dn = ("NCH", "OIH", "NCH")
    h = x
    skip_sum = jnp.zeros_like(x)
    for l in range(L):
        d = 2 ** l
        pad = (kernel_size - 1) * d
        Wc = jnp.transpose(params["wc"][l], (1, 2, 0))   # (C_out, C_in, K)
        Wg = jnp.transpose(params["wg"][l], (1, 2, 0))
        f = lax.conv_general_dilated(h, Wc, (1,), [(pad, 0)],
                                     rhs_dilation=(d,), dimension_numbers=dn)
        f = f + params["bc"][l][None, :, :]
        g = lax.conv_general_dilated(h, Wg, (1,), [(pad, 0)],
                                     rhs_dilation=(d,), dimension_numbers=dn)
        g = g + params["bg"][l][None, :, :]
        gated = jnp.tanh(f) * (1.0 / (1.0 + jnp.exp(-g)))
        res = jnp.einsum("oc,bct->bot", params["wr"][l], gated) \
            + params["br"][l][None, :, :]
        skip = jnp.einsum("oc,bct->bot", params["ws"][l], gated) \
            + params["bs"][l][None, :, :]
        h = h + res
        skip_sum = skip_sum + skip

    gg = math.gcd(orig_sr, new_sr)
    orig, new = orig_sr // gg, new_sr // gg
    if orig == new:
        return skip_sum
    kmat_np, width = _sinc_resample_kernel_np(orig, new)
    kmat = jnp.asarray(kmat_np)
    B, C, T = skip_sum.shape
    y_pad = jnp.pad(skip_sum, ((0, 0), (0, 0), (width, width + orig)))
    conv = lax.conv_general_dilated(y_pad.reshape(B * C, 1, -1),
                                    kmat[:, None, :], (orig,), "VALID",
                                    dimension_numbers=dn)   # (B*C, new, F)
    out = jnp.transpose(conv, (0, 2, 1)).reshape(B * C, -1)
    target = _ceil_div(new * T, orig)
    return out[:, :target].reshape(B, C, target)


# --------------------------------------------------------------------------
if __name__ == "__main__":
    config = dict(num_layers=4, in_channels=32, out_channels=32,
                  kernel_size=3, tgt_token_rate=50, sample_rate=75)
    B, T = 2, 128
    L = config["num_layers"]
    C_in, C_out, K = (config["in_channels"], config["out_channels"],
                      config["kernel_size"])

    key = jax.random.PRNGKey(0)
    ks = jax.random.split(key, 9)
    s = 0.1
    params = dict(
        wc=s * jax.random.normal(ks[0], (L, K, C_out, C_in), jnp.float32),
        bc=s * jax.random.normal(ks[1], (L, C_out, 1), jnp.float32),
        wg=s * jax.random.normal(ks[2], (L, K, C_out, C_in), jnp.float32),
        bg=s * jax.random.normal(ks[3], (L, C_out, 1), jnp.float32),
        wr=s * jax.random.normal(ks[4], (L, C_in, C_out), jnp.float32),
        br=s * jax.random.normal(ks[5], (L, C_in, 1), jnp.float32),
        ws=s * jax.random.normal(ks[6], (L, C_in, C_out), jnp.float32),
        bs=s * jax.random.normal(ks[7], (L, C_in, 1), jnp.float32),
    )
    x = jax.random.normal(ks[8], (B, C_in, T), jnp.float32)

    out = wavenet_decoder_forward(x, params, K,
                                  config["tgt_token_rate"],
                                  config["sample_rate"])
    out = jax.block_until_ready(out)

    ref = jax.block_until_ready(
        reference_forward(x, params, K,
                          config["tgt_token_rate"], config["sample_rate"]))

    # bf16 MXU operands with f32 accumulation vs. a pure-f32 reference:
    # expected |err| ~ few e-3; tolerance set accordingly.
    if not np.allclose(np.asarray(out), np.asarray(ref), rtol=2e-2, atol=2e-2):
        raise AssertionError("Pallas output mismatch vs reference")

    print("KERNEL_OK")
</pallas_src>

<mosaic_0001>
module attributes {stable_mosaic.version = 11 : i64} {
  func.func @kernel(%arg0: i32, %arg1: memref<1x32x256xf32, #tpu.memory_space<vmem>>, %arg2: memref<4x64x96xbf16, #tpu.memory_space<vmem>>, %arg3: memref<4x64x1xf32, #tpu.memory_space<vmem>>, %arg4: memref<4x64x32xbf16, #tpu.memory_space<vmem>>, %arg5: memref<4x64x1xf32, #tpu.memory_space<vmem>>, %arg6: memref<1x32x128xf32, #tpu.memory_space<vmem>>) attributes {dimension_semantics = [#tpu.dimension_semantics<parallel>], iteration_bounds = array<i64: 2>, scalar_prefetch = 0 : i64, scratch_operands = 0 : i64, tpu.core_type = #tpu.core_type<tc>, window_params = [{transform_indices = @transform_0, window_bounds = array<i64: 1, 32, 256>}, {pipeline_mode = #tpu.pipeline_mode<synchronous>, transform_indices = @transform_1, window_bounds = array<i64: 4, 64, 96>}, {pipeline_mode = #tpu.pipeline_mode<synchronous>, transform_indices = @transform_2, window_bounds = array<i64: 4, 64, 1>}, {pipeline_mode = #tpu.pipeline_mode<synchronous>, transform_indices = @transform_3, window_bounds = array<i64: 4, 64, 32>}, {pipeline_mode = #tpu.pipeline_mode<synchronous>, transform_indices = @transform_4, window_bounds = array<i64: 4, 64, 1>}, {transform_indices = @transform_5, window_bounds = array<i64: 1, 32, 128>}]} {
    %c0 = arith.constant 0 : index
    %c0_0 = arith.constant 0 : index
    %c0_1 = arith.constant 0 : index
    %0 = vector.load %arg1[%c0, %c0_0, %c0_1] : memref<1x32x256xf32, #tpu.memory_space<vmem>>, vector<1x32x256xf32>
    %1 = vector.shape_cast %0 : vector<1x32x256xf32> to vector<32x256xf32>
    %2 = tpu.iota {dimensions = array<i32: 1>} : vector<32x256xi32>
    %c128_i32 = arith.constant 128 : i32
    %3 = vector.broadcast %c128_i32 : i32 to vector<32x256xi32>
    %4 = arith.cmpi slt, %2, %3 : vector<32x256xi32>
    %c2_i32 = arith.constant 2 : i32
    %5 = tpu.dynamic_rotate %1 by %c2_i32 dim 1 : vector<32x256xf32>, i32 -> vector<32x256xf32>
    %c1_i32 = arith.constant 1 : i32
    %6 = tpu.dynamic_rotate %1 by %c1_i32 dim 1 : vector<32x256xf32>, i32 -> vector<32x256xf32>
    %7 = tpu.concatenate %5, %6, %1 in 0 : vector<32x256xf32>, vector<32x256xf32>, vector<32x256xf32> -> vector<96x256xf32>
    %8 = arith.truncf %7 : vector<96x256xf32> to vector<96x256xbf16>
    %c0_2 = arith.constant 0 : index
    %c0_3 = arith.constant 0 : index
    %c0_4 = arith.constant 0 : index
    %9 = vector.load %arg2[%c0_2, %c0_3, %c0_4] : memref<4x64x96xbf16, #tpu.memory_space<vmem>>, vector<1x64x96xbf16>
    %10 = vector.shape_cast %9 : vector<1x64x96xbf16> to vector<64x96xbf16>
    %cst = arith.constant dense<0.000000e+00> : vector<64x256xf32>
    %11 = tpu.matmul %10, %8, %cst {dimension_numbers = #tpu.dot_dimension_numbers<[1], [0], [0], [1], [0, 0, 1, 1], [], []>} : vector<64x96xbf16>, vector<96x256xbf16>, vector<64x256xf32> -> vector<64x256xf32>
    %c0_5 = arith.constant 0 : index
    %c0_6 = arith.constant 0 : index
    %c0_7 = arith.constant 0 : index
    %12 = vector.load %arg3[%c0_5, %c0_6, %c0_7] : memref<4x64x1xf32, #tpu.memory_space<vmem>>, vector<1x64x1xf32>
    %13 = vector.shape_cast %12 : vector<1x64x1xf32> to vector<64x1xf32>
    %14 = vector.broadcast %13 : vector<64x1xf32> to vector<64x256xf32>
    %15 = arith.addf %11, %14 : vector<64x256xf32>
    %16 = vector.extract_strided_slice %15 {offsets = [0, 0], sizes = [32, 256], strides = [1, 1]} : vector<64x256xf32> to vector<32x256xf32>
    %17 = vector.extract_strided_slice %15 {offsets = [32, 0], sizes = [32, 256], strides = [1, 1]} : vector<64x256xf32> to vector<32x256xf32>
    %18 = math.tanh %16 : vector<32x256xf32>
    %cst_8 = arith.constant 5.000000e-01 : f32
    %19 = vector.broadcast %cst_8 : f32 to vector<32x256xf32>
    %20 = arith.mulf %19, %17 : vector<32x256xf32>
    %21 = math.tanh %20 : vector<32x256xf32>
    %cst_9 = arith.constant 1.000000e+00 : f32
    %22 = vector.broadcast %cst_9 : f32 to vector<32x256xf32>
    %23 = arith.addf %21, %22 : vector<32x256xf32>
    %cst_10 = arith.constant 5.000000e-01 : f32
    %24 = vector.broadcast %cst_10 : f32 to vector<32x256xf32>
    %25 = arith.mulf %24, %23 : vector<32x256xf32>
    %26 = arith.mulf %18, %25 : vector<32x256xf32>
    %c0_11 = arith.constant 0 : index
    %c0_12 = arith.constant 0 : index
    %c0_13 = arith.constant 0 : index
    %27 = vector.load %arg4[%c0_11, %c0_12, %c0_13] : memref<4x64x32xbf16, #tpu.memory_space<vmem>>, vector<1x64x32xbf16>
    %28 = vector.shape_cast %27 : vector<1x64x32xbf16> to vector<64x32xbf16>
    %29 = arith.truncf %26 : vector<32x256xf32> to vector<32x256xbf16>
    %cst_14 = arith.constant dense<0.000000e+00> : vector<64x256xf32>
    %30 = tpu.matmul %28, %29, %cst_14 {dimension_numbers = #tpu.dot_dimension_numbers<[1], [0], [0], [1], [0, 0, 1, 1], [], []>} : vector<64x32xbf16>, vector<32x256xbf16>, vector<64x256xf32> -> vector<64x256xf32>
    %c0_15 = arith.constant 0 : index
    %c0_16 = arith.constant 0 : index
    %c0_17 = arith.constant 0 : index
    %31 = vector.load %arg5[%c0_15, %c0_16, %c0_17] : memref<4x64x1xf32, #tpu.memory_space<vmem>>, vector<1x64x1xf32>
    %32 = vector.shape_cast %31 : vector<1x64x1xf32> to vector<64x1xf32>
    %33 = vector.broadcast %32 : vector<64x1xf32> to vector<64x256xf32>
    %34 = arith.addf %30, %33 : vector<64x256xf32>
    %35 = vector.extract_strided_slice %34 {offsets = [0, 0], sizes = [32, 256], strides = [1, 1]} : vector<64x256xf32> to vector<32x256xf32>
    %36 = vector.extract_strided_slice %34 {offsets = [32, 0], sizes = [32, 256], strides = [1, 1]} : vector<64x256xf32> to vector<32x256xf32>
    %37 = arith.addf %1, %35 : vector<32x256xf32>
    %cst_18 = arith.constant 0.000000e+00 : f32
    %38 = vector.broadcast %cst_18 : f32 to vector<32x256xf32>
    %39 = arith.select %4, %38, %37 : vector<32x256xi1>, vector<32x256xf32>
    %c4_i32 = arith.constant 4 : i32
    %40 = tpu.dynamic_rotate %39 by %c4_i32 dim 1 : vector<32x256xf32>, i32 -> vector<32x256xf32>
    %c2_i32_19 = arith.constant 2 : i32
    %41 = tpu.dynamic_rotate %39 by %c2_i32_19 dim 1 : vector<32x256xf32>, i32 -> vector<32x256xf32>
    %42 = tpu.concatenate %40, %41, %39 in 0 : vector<32x256xf32>, vector<32x256xf32>, vector<32x256xf32> -> vector<96x256xf32>
    %43 = arith.truncf %42 : vector<96x256xf32> to vector<96x256xbf16>
    %c1 = arith.constant 1 : index
    %c0_20 = arith.constant 0 : index
    %c0_21 = arith.constant 0 : index
    %44 = vector.load %arg2[%c1, %c0_20, %c0_21] : memref<4x64x96xbf16, #tpu.memory_space<vmem>>, vector<1x64x96xbf16>
    %45 = vector.shape_cast %44 : vector<1x64x96xbf16> to vector<64x96xbf16>
    %cst_22 = arith.constant dense<0.000000e+00> : vector<64x256xf32>
    %46 = tpu.matmul %45, %43, %cst_22 {dimension_numbers = #tpu.dot_dimension_numbers<[1], [0], [0], [1], [0, 0, 1, 1], [], []>} : vector<64x96xbf16>, vector<96x256xbf16>, vector<64x256xf32> -> vector<64x256xf32>
    %c1_23 = arith.constant 1 : index
    %c0_24 = arith.constant 0 : index
    %c0_25 = arith.constant 0 : index
    %47 = vector.load %arg3[%c1_23, %c0_24, %c0_25] : memref<4x64x1xf32, #tpu.memory_space<vmem>>, vector<1x64x1xf32>
    %48 = vector.shape_cast %47 : vector<1x64x1xf32> to vector<64x1xf32>
    %49 = vector.broadcast %48 : vector<64x1xf32> to vector<64x256xf32>
    %50 = arith.addf %46, %49 : vector<64x256xf32>
    %51 = vector.extract_strided_slice %50 {offsets = [0, 0], sizes = [32, 256], strides = [1, 1]} : vector<64x256xf32> to vector<32x256xf32>
    %52 = vector.extract_strided_slice %50 {offsets = [32, 0], sizes = [32, 256], strides = [1, 1]} : vector<64x256xf32> to vector<32x256xf32>
    %53 = math.tanh %51 : vector<32x256xf32>
    %cst_26 = arith.constant 5.000000e-01 : f32
    %54 = vector.broadcast %cst_26 : f32 to vector<32x256xf32>
    %55 = arith.mulf %54, %52 : vector<32x256xf32>
    %56 = math.tanh %55 : vector<32x256xf32>
    %cst_27 = arith.constant 1.000000e+00 : f32
    %57 = vector.broadcast %cst_27 : f32 to vector<32x256xf32>
    %58 = arith.addf %56, %57 : vector<32x256xf32>
    %cst_28 = arith.constant 5.000000e-01 : f32
    %59 = vector.broadcast %cst_28 : f32 to vector<32x256xf32>
    %60 = arith.mulf %59, %58 : vector<32x256xf32>
    %61 = arith.mulf %53, %60 : vector<32x256xf32>
    %c1_29 = arith.constant 1 : index
    %c0_30 = arith.constant 0 : index
    %c0_31 = arith.constant 0 : index
    %62 = vector.load %arg4[%c1_29, %c0_30, %c0_31] : memref<4x64x32xbf16, #tpu.memory_space<vmem>>, vector<1x64x32xbf16>
    %63 = vector.shape_cast %62 : vector<1x64x32xbf16> to vector<64x32xbf16>
    %64 = arith.truncf %61 : vector<32x256xf32> to vector<32x256xbf16>
    %cst_32 = arith.constant dense<0.000000e+00> : vector<64x256xf32>
    %65 = tpu.matmul %63, %64, %cst_32 {dimension_numbers = #tpu.dot_dimension_numbers<[1], [0], [0], [1], [0, 0, 1, 1], [], []>} : vector<64x32xbf16>, vector<32x256xbf16>, vector<64x256xf32> -> vector<64x256xf32>
    %c1_33 = arith.constant 1 : index
    %c0_34 = arith.constant 0 : index
    %c0_35 = arith.constant 0 : index
    %66 = vector.load %arg5[%c1_33, %c0_34, %c0_35] : memref<4x64x1xf32, #tpu.memory_space<vmem>>, vector<1x64x1xf32>
    %67 = vector.shape_cast %66 : vector<1x64x1xf32> to vector<64x1xf32>
    %68 = vector.broadcast %67 : vector<64x1xf32> to vector<64x256xf32>
    %69 = arith.addf %65, %68 : vector<64x256xf32>
    %70 = vector.extract_strided_slice %69 {offsets = [0, 0], sizes = [32, 256], strides = [1, 1]} : vector<64x256xf32> to vector<32x256xf32>
    %71 = vector.extract_strided_slice %69 {offsets = [32, 0], sizes = [32, 256], strides = [1, 1]} : vector<64x256xf32> to vector<32x256xf32>
    %72 = arith.addf %36, %71 : vector<32x256xf32>
    %73 = arith.addf %39, %70 : vector<32x256xf32>
    %cst_36 = arith.constant 0.000000e+00 : f32
    %74 = vector.broadcast %cst_36 : f32 to vector<32x256xf32>
    %75 = arith.select %4, %74, %73 : vector<32x256xi1>, vector<32x256xf32>
    %c8_i32 = arith.constant 8 : i32
    %76 = tpu.dynamic_rotate %75 by %c8_i32 dim 1 : vector<32x256xf32>, i32 -> vector<32x256xf32>
    %c4_i32_37 = arith.constant 4 : i32
    %77 = tpu.dynamic_rotate %75 by %c4_i32_37 dim 1 : vector<32x256xf32>, i32 -> vector<32x256xf32>
    %78 = tpu.concatenate %76, %77, %75 in 0 : vector<32x256xf32>, vector<32x256xf32>, vector<32x256xf32> -> vector<96x256xf32>
    %79 = arith.truncf %78 : vector<96x256xf32> to vector<96x256xbf16>
    %c2 = arith.constant 2 : index
    %c0_38 = arith.constant 0 : index
    %c0_39 = arith.constant 0 : index
    %80 = vector.load %arg2[%c2, %c0_38, %c0_39] : memref<4x64x96xbf16, #tpu.memory_space<vmem>>, vector<1x64x96xbf16>
    %81 = vector.shape_cast %80 : vector<1x64x96xbf16> to vector<64x96xbf16>
    %cst_40 = arith.constant dense<0.000000e+00> : vector<64x256xf32>
    %82 = tpu.matmul %81, %79, %cst_40 {dimension_numbers = #tpu.dot_dimension_numbers<[1], [0], [0], [1], [0, 0, 1, 1], [], []>} : vector<64x96xbf16>, vector<96x256xbf16>, vector<64x256xf32> -> vector<64x256xf32>
    %c2_41 = arith.constant 2 : index
    %c0_42 = arith.constant 0 : index
    %c0_43 = arith.constant 0 : index
    %83 = vector.load %arg3[%c2_41, %c0_42, %c0_43] : memref<4x64x1xf32, #tpu.memory_space<vmem>>, vector<1x64x1xf32>
    %84 = vector.shape_cast %83 : vector<1x64x1xf32> to vector<64x1xf32>
    %85 = vector.broadcast %84 : vector<64x1xf32> to vector<64x256xf32>
    %86 = arith.addf %82, %85 : vector<64x256xf32>
    %87 = vector.extract_strided_slice %86 {offsets = [0, 0], sizes = [32, 256], strides = [1, 1]} : vector<64x256xf32> to vector<32x256xf32>
    %88 = vector.extract_strided_slice %86 {offsets = [32, 0], sizes = [32, 256], strides = [1, 1]} : vector<64x256xf32> to vector<32x256xf32>
    %89 = math.tanh %87 : vector<32x256xf32>
    %cst_44 = arith.constant 5.000000e-01 : f32
    %90 = vector.broadcast %cst_44 : f32 to vector<32x256xf32>
    %91 = arith.mulf %90, %88 : vector<32x256xf32>
    %92 = math.tanh %91 : vector<32x256xf32>
    %cst_45 = arith.constant 1.000000e+00 : f32
    %93 = vector.broadcast %cst_45 : f32 to vector<32x256xf32>
    %94 = arith.addf %92, %93 : vector<32x256xf32>
    %cst_46 = arith.constant 5.000000e-01 : f32
    %95 = vector.broadcast %cst_46 : f32 to vector<32x256xf32>
    %96 = arith.mulf %95, %94 : vector<32x256xf32>
    %97 = arith.mulf %89, %96 : vector<32x256xf32>
    %c2_47 = arith.constant 2 : index
    %c0_48 = arith.constant 0 : index
    %c0_49 = arith.constant 0 : index
    %98 = vector.load %arg4[%c2_47, %c0_48, %c0_49] : memref<4x64x32xbf16, #tpu.memory_space<vmem>>, vector<1x64x32xbf16>
    %99 = vector.shape_cast %98 : vector<1x64x32xbf16> to vector<64x32xbf16>
    %100 = arith.truncf %97 : vector<32x256xf32> to vector<32x256xbf16>
    %cst_50 = arith.constant dense<0.000000e+00> : vector<64x256xf32>
    %101 = tpu.matmul %99, %100, %cst_50 {dimension_numbers = #tpu.dot_dimension_numbers<[1], [0], [0], [1], [0, 0, 1, 1], [], []>} : vector<64x32xbf16>, vector<32x256xbf16>, vector<64x256xf32> -> vector<64x256xf32>
    %c2_51 = arith.constant 2 : index
    %c0_52 = arith.constant 0 : index
    %c0_53 = arith.constant 0 : index
    %102 = vector.load %arg5[%c2_51, %c0_52, %c0_53] : memref<4x64x1xf32, #tpu.memory_space<vmem>>, vector<1x64x1xf32>
    %103 = vector.shape_cast %102 : vector<1x64x1xf32> to vector<64x1xf32>
    %104 = vector.broadcast %103 : vector<64x1xf32> to vector<64x256xf32>
    %105 = arith.addf %101, %104 : vector<64x256xf32>
    %106 = vector.extract_strided_slice %105 {offsets = [0, 0], sizes = [32, 256], strides = [1, 1]} : vector<64x256xf32> to vector<32x256xf32>
    %107 = vector.extract_strided_slice %105 {offsets = [32, 0], sizes = [32, 256], strides = [1, 1]} : vector<64x256xf32> to vector<32x256xf32>
    %108 = arith.addf %72, %107 : vector<32x256xf32>
    %109 = arith.addf %75, %106 : vector<32x256xf32>
    %cst_54 = arith.constant 0.000000e+00 : f32
    %110 = vector.broadcast %cst_54 : f32 to vector<32x256xf32>
    %111 = arith.select %4, %110, %109 : vector<32x256xi1>, vector<32x256xf32>
    %c16_i32 = arith.constant 16 : i32
    %112 = tpu.dynamic_rotate %111 by %c16_i32 dim 1 : vector<32x256xf32>, i32 -> vector<32x256xf32>
    %c8_i32_55 = arith.constant 8 : i32
    %113 = tpu.dynamic_rotate %111 by %c8_i32_55 dim 1 : vector<32x256xf32>, i32 -> vector<32x256xf32>
    %114 = tpu.concatenate %112, %113, %111 in 0 : vector<32x256xf32>, vector<32x256xf32>, vector<32x256xf32> -> vector<96x256xf32>
    %115 = arith.truncf %114 : vector<96x256xf32> to vector<96x256xbf16>
    %c3 = arith.constant 3 : index
    %c0_56 = arith.constant 0 : index
    %c0_57 = arith.constant 0 : index
    %116 = vector.load %arg2[%c3, %c0_56, %c0_57] : memref<4x64x96xbf16, #tpu.memory_space<vmem>>, vector<1x64x96xbf16>
    %117 = vector.shape_cast %116 : vector<1x64x96xbf16> to vector<64x96xbf16>
    %cst_58 = arith.constant dense<0.000000e+00> : vector<64x256xf32>
    %118 = tpu.matmul %117, %115, %cst_58 {dimension_numbers = #tpu.dot_dimension_numbers<[1], [0], [0], [1], [0, 0, 1, 1], [], []>} : vector<64x96xbf16>, vector<96x256xbf16>, vector<64x256xf32> -> vector<64x256xf32>
    %c3_59 = arith.constant 3 : index
    %c0_60 = arith.constant 0 : index
    %c0_61 = arith.constant 0 : index
    %119 = vector.load %arg3[%c3_59, %c0_60, %c0_61] : memref<4x64x1xf32, #tpu.memory_space<vmem>>, vector<1x64x1xf32>
    %120 = vector.shape_cast %119 : vector<1x64x1xf32> to vector<64x1xf32>
    %121 = vector.broadcast %120 : vector<64x1xf32> to vector<64x256xf32>
    %122 = arith.addf %118, %121 : vector<64x256xf32>
    %123 = vector.extract_strided_slice %122 {offsets = [0, 0], sizes = [32, 256], strides = [1, 1]} : vector<64x256xf32> to vector<32x256xf32>
    %124 = vector.extract_strided_slice %122 {offsets = [32, 0], sizes = [32, 256], strides = [1, 1]} : vector<64x256xf32> to vector<32x256xf32>
    %125 = math.tanh %123 : vector<32x256xf32>
    %cst_62 = arith.constant 5.000000e-01 : f32
    %126 = vector.broadcast %cst_62 : f32 to vector<32x256xf32>
    %127 = arith.mulf %126, %124 : vector<32x256xf32>
    %128 = math.tanh %127 : vector<32x256xf32>
    %cst_63 = arith.constant 1.000000e+00 : f32
    %129 = vector.broadcast %cst_63 : f32 to vector<32x256xf32>
    %130 = arith.addf %128, %129 : vector<32x256xf32>
    %cst_64 = arith.constant 5.000000e-01 : f32
    %131 = vector.broadcast %cst_64 : f32 to vector<32x256xf32>
    %132 = arith.mulf %131, %130 : vector<32x256xf32>
    %133 = arith.mulf %125, %132 : vector<32x256xf32>
    %c3_65 = arith.constant 3 : index
    %c0_66 = arith.constant 0 : index
    %c0_67 = arith.constant 0 : index
    %134 = vector.load %arg4[%c3_65, %c0_66, %c0_67] : memref<4x64x32xbf16, #tpu.memory_space<vmem>>, vector<1x64x32xbf16>
    %135 = vector.shape_cast %134 : vector<1x64x32xbf16> to vector<64x32xbf16>
    %136 = arith.truncf %133 : vector<32x256xf32> to vector<32x256xbf16>
    %cst_68 = arith.constant dense<0.000000e+00> : vector<64x256xf32>
    %137 = tpu.matmul %135, %136, %cst_68 {dimension_numbers = #tpu.dot_dimension_numbers<[1], [0], [0], [1], [0, 0, 1, 1], [], []>} : vector<64x32xbf16>, vector<32x256xbf16>, vector<64x256xf32> -> vector<64x256xf32>
    %c3_69 = arith.constant 3 : index
    %c0_70 = arith.constant 0 : index
    %c0_71 = arith.constant 0 : index
    %138 = vector.load %arg5[%c3_69, %c0_70, %c0_71] : memref<4x64x1xf32, #tpu.memory_space<vmem>>, vector<1x64x1xf32>
    %139 = vector.shape_cast %138 : vector<1x64x1xf32> to vector<64x1xf32>
    %140 = vector.broadcast %139 : vector<64x1xf32> to vector<64x256xf32>
    %141 = arith.addf %137, %140 : vector<64x256xf32>
    %142 = vector.extract_strided_slice %141 {offsets = [32, 0], sizes = [32, 256], strides = [1, 1]} : vector<64x256xf32> to vector<32x256xf32>
    %143 = arith.addf %108, %142 : vector<32x256xf32>
    %144 = vector.extract_strided_slice %143 {offsets = [0, 128], sizes = [32, 128], strides = [1, 1]} : vector<32x256xf32> to vector<32x128xf32>
    %c0_72 = arith.constant 0 : index
    %c0_73 = arith.constant 0 : index
    %c0_74 = arith.constant 0 : index
    %145 = vector.load %arg6[%c0_72, %c0_73, %c0_74] : memref<1x32x128xf32, #tpu.memory_space<vmem>>, vector<1x32x128xf32>
    %146 = vector.shape_cast %145 : vector<1x32x128xf32> to vector<32x128xf32>
    %147 = vector.shape_cast %144 : vector<32x128xf32> to vector<1x32x128xf32>
    tpu.vector_store %arg6[%c0_72, %c0_73, %c0_74], %147 {strides = array<i32>} : memref<1x32x128xf32, #tpu.memory_space<vmem>>, vector<1x32x128xf32>,
    return
  }
  func.func @transform_0(%arg0: i32) -> (i32, i32, i32) {
    %c0_i32 = arith.constant 0 : i32
    %c0_i32_0 = arith.constant 0 : i32
    %c0_i32_1 = arith.constant 0 : i32
    return %arg0, %c0_i32, %c0_i32_0 : i32, i32, i32
  }
  func.func @transform_1(%arg0: i32) -> (i32, i32, i32) {
    %c0_i32 = arith.constant 0 : i32
    %c0_i32_0 = arith.constant 0 : i32
    %c0_i32_1 = arith.constant 0 : i32
    %c0_i32_2 = arith.constant 0 : i32
    return %c0_i32, %c0_i32_0, %c0_i32_1 : i32, i32, i32
  }
  func.func @transform_2(%arg0: i32) -> (i32, i32, i32) {
    %c0_i32 = arith.constant 0 : i32
    %c0_i32_0 = arith.constant 0 : i32
    %c0_i32_1 = arith.constant 0 : i32
    %c0_i32_2 = arith.constant 0 : i32
    return %c0_i32, %c0_i32_0, %c0_i32_1 : i32, i32, i32
  }
  func.func @transform_3(%arg0: i32) -> (i32, i32, i32) {
    %c0_i32 = arith.constant 0 : i32
    %c0_i32_0 = arith.constant 0 : i32
    %c0_i32_1 = arith.constant 0 : i32
    %c0_i32_2 = arith.constant 0 : i32
    return %c0_i32, %c0_i32_0, %c0_i32_1 : i32, i32, i32
  }
  func.func @transform_4(%arg0: i32) -> (i32, i32, i32) {
    %c0_i32 = arith.constant 0 : i32
    %c0_i32_0 = arith.constant 0 : i32
    %c0_i32_1 = arith.constant 0 : i32
    %c0_i32_2 = arith.constant 0 : i32
    return %c0_i32, %c0_i32_0, %c0_i32_1 : i32, i32, i32
  }
  func.func @transform_5(%arg0: i32) -> (i32, i32, i32) {
    %c0_i32 = arith.constant 0 : i32
    %c0_i32_0 = arith.constant 0 : i32
    %c0_i32_1 = arith.constant 0 : i32
    return %arg0, %c0_i32, %c0_i32_0 : i32, i32, i32
  }
}

</mosaic_0001>

<bundles_post_ra>
// kernel: tpu_custom_call.1
= control target key start
LH: loop header
LB: loop body
LE: loop exit
PB: predicated region body
PF: predicated region fallthrough
CT: control target
= control target key end

     0   :  { %10 = vsyncpa [#allocation3], 0  ;;  %s3541_s0 = inlined_call_operand.vmem [shape: f32[2,32,256], index: 0, kind: input, shape index: {}]   ;;  %s3542_s1 = inlined_call_operand.vmem [shape: bf16[4,64,96], index: 1, kind: input, shape index: {}]   ;;  %s3543_s2 = inlined_call_operand.vmem [shape: f32[4,64,1], index: 2, kind: input, shape index: {}]   ;;  %s3544_s3 = inlined_call_operand.vmem [shape: bf16[4,64,32], index: 3, kind: input, shape index: {}]   ;;  %s3545_s4 = inlined_call_operand.vmem [shape: f32[4,64,1], index: 4, kind: input, shape index: {}]   ;;  %s3546_s5 = inlined_call_operand.hbm [shape: f32[2,32,128], index: 5, kind: output, shape index: {}]  }
   0x1   :  { %12 = vsyncpa [#allocation3 + $0x1], 0  ;;  %s2804_s18 = smov 0   ;;  %s2806_s19 = smov 0  }
   0x2   :  { %s2808_s20 = smov 0   ;;  %s2810_s21 = smov 0  }
   0x3 LB: > { %s2825_s22 = sadd.s32 4294967295, %s2762_s21   ;;  %s2104_s23 = sadd.s32 4294967294, %s2762_s21   ;;  %s2762_s21 = sphi %s2810_s21, %s3552_s21   ;;  %s2758_s20 = sphi %s2808_s20, %s3551_s20   ;;  %s2754_s19 = sphi %s2806_s19, %s3550_s19   ;;  %s2750_s18 = sphi %s2804_s18, %s3549_s18  }
   0x4   : > { %s2829_s24 = sadd.s32 1, %s2762_s21   ;;  %s135_s25 = sadd.s32 1, %s2758_s20 }
   0x5   : > { %s132_s26 = ssub.s32 %s2762_s21, %s2829_s24  ;;  %p145_p0 = scmp.ne.s32.totalorder %s2758_s20, %s2754_s19 }
   0x6   : > { %p133_p1 = scmp.eq.s32.totalorder %s132_s26, 0  ;;  %p146_p2 = scmp.eq.s32.totalorder %s2825_s22, 1 }
   0x7   : > { %p151_p3 = scmp.ne.s32.totalorder %s2754_s19, %s2750_s18  ;;  %p152_p4 = scmp.eq.s32.totalorder %s2104_s23, 1 }
   0x8   : > { %s2840_s27 = scalar_select %p133_p1, %s2758_s20, %s135_s25  }
   0x9   : > { %p2842_p5 = por %p146_p2, %p145_p0  ;;  %p2846_p6 = por %p152_p4, %p151_p3 }
   0xa   : > { %p2107_p7 = scmp.ge.s32.totalorder %s2762_s21, 1  ;;  %p190_p8 = scmp.lt.s32.totalorder %s2762_s21, 3 }
   0xc   : > { %p191_p9 = pnand %p2107_p7, %p190_p8 }
   0xd   : > { %p218_p10 = scmp.lt.s32.totalorder (!%p191_p9), %s2825_s22, 1  ;;  %v2764_v0 = vmov (!%p191_p9), 0   ;;  %s2765_s10 = smov (!%p191_p9), 2   ;;  %v312_v13 = vld [vmem:[%s3543_s2 + $0x28] sm:$0xff] (!%p191_p9)  ;;  %v313_v15 = vld [vmem:[%s3543_s2 + $0x30] sm:$0xff] (!%p191_p9)  ;;  %v307_v17 = vld [vmem:[%s3543_s2] sm:$0xff] (!%p191_p9)  ;;  %v232_v39 = vlaneseq (!%p191_p9) }
   0xe   : > { %194 = sbr.rel (%p191_p9) target bundleno = 2601 (0xa29), region = 40  ;;  %2419 = vset.pattern.permute.xlu1 (!%p191_p9), %v2764_v0  ;;  %420 = vmatprep.mubr.bf16.mxu0 (!%p191_p9), %v2764_v0  ;;  %s2766_s11 = smov (!%p191_p9), 1   ;;  %v309_v18 = vld [vmem:[%s3543_s2 + $0x10] sm:$0xff] (!%p191_p9)  ;;  %v521_v19 = vld [vmem:[%s3545_s4] sm:$0xff] (!%p191_p9)  ;;  %v2767_v21 = vmov (!%p191_p9), 0.0   ;;  %v314_v23 = vld [vmem:[%s3543_s2 + $0x38] sm:$0xff] (!%p191_p9) }
   0xf   : > { %2418 = vset.pattern.permute.xlu0 (!%p191_p9), %v2764_v0  ;;  %634 = vmatprep.mubr.bf16.mxu1 (!%p191_p9), %v2764_v0  ;;  %v523_v20 = vld [vmem:[%s3545_s4 + $0x10] sm:$0xff] (!%p191_p9)  ;;  %s2768_s8 = smov (!%p191_p9), 4   ;;  %v311_v22 = vld [vmem:[%s3543_s2 + $0x20] sm:$0xff] (!%p191_p9)  ;;  %v308_v25 = vld [vmem:[%s3543_s2 + $0x8] sm:$0xff] (!%p191_p9)  ;;  %s2769_s26 = smov (!%p191_p9), 8   ;;  %v2981_v42 = vand.u32 (!%p191_p9), 127, %v232_v39 }
  0x10   : > { %v2139_v24 = vld [vmem:[%s3543_s2 + $0x60] sm:$0xff] (!%p191_p9)  ;;  %v2141_v26 = vld [vmem:[%s3543_s2 + $0x70] sm:$0xff] (!%p191_p9)  ;;  %v310_v27 = vld [vmem:[%s3543_s2 + $0x18] sm:$0xff] (!%p191_p9)  ;;  %s2770_s25 = smov (!%p191_p9), 16   ;;  %vm375_vm2 = vcmask (!%p191_p9), 785408   ;;  %vm589_vm3 = vcmask (!%p191_p9), 261120  }
  0x11   : > { %v2135_v28 = vld [vmem:[%s3543_s2 + $0x40] sm:$0xff] (!%p191_p9)  ;;  %v522_v29 = vld [vmem:[%s3545_s4 + $0x8] sm:$0xff] (!%p191_p9)  ;;  %v2137_v30 = vld [vmem:[%s3543_s2 + $0x50] sm:$0xff] (!%p191_p9)  ;;  %vm253_vm0 = vcmp.lt.s32.totalorder (!%p191_p9), %v2981_v42, 2  ;;  %vm278_vm1 = vcmp.lt.s32.totalorder (!%p191_p9), %v2981_v42, 1  ;;  %vm703_vm4 = vcmp.lt.s32.totalorder (!%p191_p9), %v2981_v42, 4 }
  0x12   : > { %v524_v31 = vld [vmem:[%s3545_s4 + $0x18] sm:$0xff] (!%p191_p9)  ;;  %v2159_v32 = vld [vmem:[%s3545_s4 + $0x40] sm:$0xff] (!%p191_p9)  ;;  %v2161_v33 = vld [vmem:[%s3545_s4 + $0x50] sm:$0xff] (!%p191_p9)  ;;  %vm1158_vm5 = vcmp.lt.s32.totalorder (!%p191_p9), %v2981_v42, 8  ;;  %vm1613_vm6 = vcmp.lt.s32.totalorder (!%p191_p9), %v2981_v42, 16  ;;  %s2277_s12 = sshll.u32 (!%p191_p9), %s2825_s22, 9 }
  0x13   : > { %v2187_v34 = vld [vmem:[%s3543_s2 + $0xa0] sm:$0xff] (!%p191_p9)  ;;  %v2189_v35 = vld [vmem:[%s3543_s2 + $0xb0] sm:$0xff] (!%p191_p9)  ;;  %v2563_v42 = vld [vmem:[%s3542_s1 + $0x68] sm:$0xff] (!%p191_p9)   ;;  %s2772_s16 = smov (!%p191_p9), [#allocation2]  }
  0x14   : > { %v2183_v36 = vld [vmem:[%s3543_s2 + $0x80] sm:$0xff] (!%p191_p9)  ;;  %v2185_v37 = vld [vmem:[%s3543_s2 + $0x90] sm:$0xff] (!%p191_p9) }
  0x15   : > { %s219_s30 = scalar_select %p218_p10, %s2825_s22, 1  ;;  %v2207_v38 = vld [vmem:[%s3545_s4 + $0x80] sm:$0xff]  ;;  %v2209_v40 = vld [vmem:[%s3545_s4 + $0x90] sm:$0xff] }
  0x17   : > { %s2276_s6 = sshll.u32 %s219_s30, 6 }
  0x18   : > { %s222_s9 = scalar_lea.vmem %s3541_s0, %s2276_s6  ;;  %s215_s6 = sand.u32 1, %s2754_s19  }
  0x19   : > { %v2861_v1 = vld [vmem:[%s222_s9 + $0x20] sm:$0xff]  ;;  %v2863_v2 = vld [vmem:[%s222_s9 + $0x30] sm:$0xff]  ;;  %v2871_v6 = vld [vmem:[%s222_s9 + $0x28] sm:$0xff]  ;;  %s2108_s7 = sshll.u32 %s215_s6, 5  ;;  %s3499_s15 = scalar_lea.sflag [#allocation3], %s215_s6 }
  0x1a   : > { %v2865_v3 = vld [vmem:[%s222_s9] sm:$0xff]  ;;  %v2388_v4 = vpack.i.bf16 %v2863_v2, %v2861_v1  ;;  %v2869_v5 = vld [vmem:[%s222_s9 + $0x10] sm:$0xff]  ;;  %v2873_v7 = vld [vmem:[%s222_s9 + $0x38] sm:$0xff]  ;;  %v297_v16 = vpack.c.bf16 %v2863_v2, %v2861_v1 }
  0x1b   : > { %v2378_v8 = vpack.i.bf16 %v2869_v5, %v2865_v3  ;;  %v2877_v9 = vld [vmem:[%s222_s9 + $0x8] sm:$0xff]  ;;  %v2879_v10 = vld [vmem:[%s222_s9 + $0x18] sm:$0xff]  ;;  %v2393_v11 = vpack.i.bf16 %v2873_v7, %v2871_v6  ;;  %v295_v14 = vpack.c.bf16 %v2869_v5, %v2865_v3  ;;  %v525_v3 = vld [vmem:[%s3545_s4 + $0x20] sm:$0xff]  ;;  %s217_s9 = scalar_lea.vmem [#allocation2], %s2108_s7 }
  0x1c   : > { %2389 = vrot.lane.b32.xlu1 %v2388_v4, %s2765_s10  ;;  %v2383_v12 = vpack.i.bf16 %v2879_v10, %v2877_v9  ;;  %v296_v39 = vpack.c.bf16 %v2879_v10, %v2877_v9  ;;  %v2541_v5 = vld [vmem:[%s3542_s1 + $0x8] sm:$0xff]   ;;  %v527_v1 = vld [vmem:[%s3545_s4 + $0x30] sm:$0xff]  ;;  %v2163_v2 = vld [vmem:[%s3545_s4 + $0x60] sm:$0xff] }
  0x1d   : > { %2379 = vrot.lane.b32.xlu0 %v2378_v8, %s2765_s10 }
  0x20   : > { %2394 = vrot.lane.b32.xlu1 %v2393_v11, %s2765_s10 }
  0x21   : > { %2384 = vrot.lane.b32.xlu0 %v2383_v12, %s2765_s10 }
  0x24   : > { %2404 = vrot.lane.b32.xlu1 %v2383_v12, %s2766_s11 }
  0x25   : > { %2399 = vrot.lane.b32.xlu0 %v2378_v8, %s2766_s11 }
  0x28   : > { %2414 = vrot.lane.b32.xlu1 %v2393_v11, %s2766_s11 }
  0x29   : > { %2409 = vrot.lane.b32.xlu0 %v2388_v4, %s2766_s11  ;;  %s2042_s11 = sshll.u32 %s217_s9, 4  ;;  %s3490_s11 = int_to_ptr.vmem [resolvable:$true] %s2042_s11 }
  0x2a   : > { %s2700_s22 = scalar_lea.vmem %s3490_s11, 512 }
  0x2b   : > { %p2701_p11 = scmp.ne.s32.totalorder %s3490_s11, %s2700_s22 }
  0x2c   : > { %342 = vperm.xlu1 %2419, %v312_v13  }
  0x2d   : > { %337 = vperm.xlu0 %2418, %v311_v22   ;;  %p2702_p12 = pnand %p2701_p11, %p2842_p5 }
  0x2f   : > { %p2703_p13 = pneg %p2702_p12 }
  0x30   : > { %347 = vperm.xlu1 %2419, %v313_v15  }
  0x31   : > { %352 = vperm.xlu0 %2418, %v314_v23  }
  0x34   : > { %317 = vperm.xlu1 %2419, %v307_v17  }
  0x35   : > { %322 = vperm.xlu0 %2418, %v308_v25  }
  0x38   : > { %327 = vperm.xlu1 %2419, %v309_v18  }
  0x39   : > { %332 = vperm.xlu0 %2418, %v310_v27  }
  0x3c   : > { %531 = vperm.xlu1 %2419, %v521_v19  }
  0x3d   : > { %536 = vperm.xlu0 %2418, %v522_v29  }
  0x40   : > { %541 = vperm.xlu1 %2419, %v523_v20  }
  0x41   : > { %546 = vperm.xlu0 %2418, %v524_v31  }
  0x44   : > { %2421 = vrot.lane.b32.xlu1 %v2767_v21, %s2768_s8 }
  0x48   : > { %2426 = vrot.lane.b32.xlu1 %v2767_v21, %s2768_s8 }
  0x4c   : > { %2431 = vrot.lane.b32.xlu1 %v2767_v21, %s2765_s10 }
  0x50   : > { %2451 = vrot.lane.b32.xlu1 %v2767_v21, %s2765_s10 }
  0x54   : > { %788 = vperm.xlu1 %2419, %v2139_v24  }
  0x58   : > { %798 = vperm.xlu1 %2419, %v2141_v26  }
  0x5c   : > { %768 = vperm.xlu1 %2419, %v2135_v28  }
  0x60   : > { %778 = vperm.xlu1 %2419, %v2137_v30  }
  0x64   : > { %983 = vperm.xlu1 %2419, %v2159_v32  }
  0x68   : > { %993 = vperm.xlu1 %2419, %v2161_v33  }
  0x6c   : > { %2461 = vrot.lane.b32.xlu1 %v2767_v21, %s2769_s26 }
  0x70   : > { %2466 = vrot.lane.b32.xlu1 %v2767_v21, %s2769_s26 }
  0x74   : > { %2471 = vrot.lane.b32.xlu1 %v2767_v21, %s2768_s8 }
  0x78   : > { %2491 = vrot.lane.b32.xlu1 %v2767_v21, %s2768_s8 }
  0x7c   : > { %1243 = vperm.xlu1 %2419, %v2187_v34  }
  0x80   : > { %1253 = vperm.xlu1 %2419, %v2189_v35  }
  0x84   : > { %1223 = vperm.xlu1 %2419, %v2183_v36  }
  0x88   : > { %1233 = vperm.xlu1 %2419, %v2185_v37   ;;  %v2235_v37 = vld [vmem:[%s3543_s2 + $0xe0] sm:$0xff] }
  0x8c   : > { %1438 = vperm.xlu1 %2419, %v2207_v38  }
  0x8e   : > { %v2390_v41 = vpop.permute.xlu1 %2389 }
  0x8f   : > { %v2380_v43 = vpop.permute.xlu0 %2379  ;;  %v2392_v44 = vunpack.i.h.bf16 %v2390_v41  ;;  %v2391_v45 = vunpack.i.l.bf16 %v2390_v41  ;;  %v2231_v41 = vld [vmem:[%s3543_s2 + $0xc0] sm:$0xff] }
  0x90   : > { %1448 = vperm.xlu1 %2419, %v2209_v40   ;;  %v2382_v50 = vunpack.i.h.bf16 %v2380_v43  ;;  %v2381_v51 = vunpack.i.l.bf16 %v2380_v43  ;;  %v2237_v40 = vld [vmem:[%s3543_s2 + $0xf0] sm:$0xff]  ;;  %v2540_v43 = vld [vmem:[%s3542_s1] sm:$0xff]  }
  0x92   : > { %v2395_v46 = vpop.permute.xlu1 %2394 }
  0x93   : > { %v2397_v47 = vunpack.i.h.bf16 %v2395_v46  ;;  %v2396_v48 = vunpack.i.l.bf16 %v2395_v46  ;;  %v2385_v49 = vpop.permute.xlu0 %2384  ;;  %v2543_v46 = vld [vmem:[%s3542_s1 + $0x18] sm:$0xff]  }
  0x94   : > { %v2387_v52 = vunpack.i.h.bf16 %v2385_v49  ;;  %v2386_v53 = vunpack.i.l.bf16 %v2385_v49  ;;  %2501 = vrot.lane.b32.xlu1 %v2767_v21, %s2770_s25  ;;  %v2261_v49 = vld [vmem:[%s3545_s4 + $0xf0] sm:$0xff] }
  0x95   : > { %v256_v54 = vsel %vm253_vm0, %v2391_v45, %v2396_v48  ;;  %v257_v55 = vsel %vm253_vm0, %v2392_v44, %v2397_v47  ;;  %v260_v15 = vsel %vm253_vm0, %v2396_v48, %v2391_v45  ;;  %v261_v17 = vsel %vm253_vm0, %v2397_v47, %v2392_v44  ;;  %v2233_v44 = vld [vmem:[%s3543_s2 + $0xd0] sm:$0xff]  ;;  %v2211_v45 = vld [vmem:[%s3545_s4 + $0xa0] sm:$0xff] }
  0x96   : > { %v254_v56 = vsel %vm253_vm0, %v2381_v51, %v2386_v53  ;;  %v255_v57 = vsel %vm253_vm0, %v2382_v50, %v2387_v52  ;;  %v258_v58 = vsel %vm253_vm0, %v2386_v53, %v2381_v51  ;;  %v259_v59 = vsel %vm253_vm0, %v2387_v52, %v2382_v50  ;;  %v2405_v60 = vpop.permute.xlu1 %2404  ;;  %v2213_v47 = vld [vmem:[%s3545_s4 + $0xb0] sm:$0xff]  ;;  %v2259_v48 = vld [vmem:[%s3545_s4 + $0xe0] sm:$0xff] }
  0x97   : > { %v288_v61 = vpack.c.bf16 %v255_v57, %v254_v56  ;;  %v287_v62 = vpack.c.bf16 %v259_v59, %v258_v58  ;;  %v2407_v63 = vunpack.i.h.bf16 %v2405_v60  ;;  %v2406_v4 = vunpack.i.l.bf16 %v2405_v60  ;;  %v2400_v8 = vpop.permute.xlu0 %2399 }
  0x98   : > { %v2402_v11 = vunpack.i.h.bf16 %v2400_v8  ;;  %v2401_v12 = vunpack.i.l.bf16 %v2400_v8  ;;  %2506 = vrot.lane.b32.xlu1 %v2767_v21, %s2770_s25  ;;  %v290_v13 = vpack.c.bf16 %v257_v55, %v256_v54  ;;  %v289_v28 = vpack.c.bf16 %v261_v17, %v260_v15 }
  0x99   : > { %388 = vmatprep.subr.bf16.mxu0 %v288_v61 }
  0x9a   : > { %389 = vmatpush1.bf16.msra.mxu0 %v287_v62  ;;  %v2415_v18 = vpop.permute.xlu1 %2414  ;;  %v279_v19 = vsel %vm278_vm1, %v2401_v12, %v2406_v4  ;;  %v280_v20 = vsel %vm278_vm1, %v2402_v11, %v2407_v63  ;;  %v283_v22 = vsel %vm278_vm1, %v2406_v4, %v2401_v12  ;;  %v284_v27 = vsel %vm278_vm1, %v2407_v63, %v2402_v11 }
  0x9b   : > { %390 = vmatprep.subr.bf16.mxu0 %v290_v13  ;;  %v2417_v23 = vunpack.i.h.bf16 %v2415_v18  ;;  %v2416_v24 = vunpack.i.l.bf16 %v2415_v18  ;;  %v2410_v25 = vpop.permute.xlu0 %2409  ;;  %v292_v26 = vpack.c.bf16 %v280_v20, %v279_v19  ;;  %v291_v31 = vpack.c.bf16 %v284_v27, %v283_v22 }
  0x9c   : > { %v2412_v29 = vunpack.i.h.bf16 %v2410_v25  ;;  %v2411_v30 = vunpack.i.l.bf16 %v2410_v25  ;;  %2511 = vrot.lane.b32.xlu1 %v2767_v21, %s2769_s26 }
  0x9e   : > { %391 = vmatpush1.bf16.msra.mxu0 %v289_v28  ;;  %v281_v32 = vsel %vm278_vm1, %v2411_v30, %v2416_v24  ;;  %v282_v33 = vsel %vm278_vm1, %v2412_v29, %v2417_v23  ;;  %v285_v35 = vsel %vm278_vm1, %v2416_v24, %v2411_v30  ;;  %v286_v36 = vsel %vm278_vm1, %v2417_v23, %v2412_v29 }
  0x9f   : > { %392 = vmatprep.subr.bf16.mxu0 %v292_v26  ;;  %v294_v34 = vpack.c.bf16 %v282_v33, %v281_v32  ;;  %v293_v38 = vpack.c.bf16 %v286_v36, %v285_v35 }
  0xa0   : > { %2531 = vrot.lane.b32.xlu1 %v2767_v21, %s2769_s26  ;;  %v298_v21 = vpack.c.bf16 %v2873_v7, %v2871_v6 }
  0xa2   : > { %393 = vmatpush1.bf16.msra.mxu0 %v291_v31 }
  0xa3   : > { %394 = vmatprep.subr.bf16.mxu0 %v294_v34 }
  0xa4   : > { %1698 = vperm.xlu1 %2419, %v2235_v37  }
  0xa6   : > { %395 = vmatpush1.bf16.msra.mxu0 %v293_v38 }
  0xa7   : > { %396 = vmatprep.subr.bf16.mxu0 %v296_v39 }
  0xa8   : > { %1708 = vperm.xlu1 %2419, %v2237_v40  }
  0xaa   : > { %397 = vmatpush1.bf16.msra.mxu0 %v295_v14  ;;  %v2542_v14 = vld [vmem:[%s3542_s1 + $0x10] sm:$0xff]  }
  0xab   : > { %398 = vmatprep.subr.bf16.mxu0 %v298_v21  ;;  %v343_v54 = vpop.permute.xlu1 %342 }
  0xac   : > { %1678 = vperm.xlu1 %2419, %v2231_v41   ;;  %v338_v55 = vpop.permute.xlu0 %337 }
  0xae   : > { %399 = vmatpush1.bf16.msra.mxu0 %v297_v16  ;;  %v2165_v16 = vld [vmem:[%s3545_s4 + $0x70] sm:$0xff] }
  0xaf   : > { %v348_v60 = vpop.permute.xlu1 %347 }
  0xb0   : > { %1688 = vperm.xlu1 %2419, %v2233_v44   ;;  %v353_v61 = vpop.permute.xlu0 %352 }
  0xb1   : > { %2115 = vmatmul.mubr.msk.bf16.vlgmr.msra.gmra.mrb[0].mxu0 %vm375_vm2, %v2540_v43 }
  0xb2   : > { %430 = vmatprep.mubr.bf16.mxu0 %v2764_v0 }
  0xb3   : > { %v318_v17 = vpop.permute.xlu1 %317 }
  0xb4   : > { %551 = vperm.xlu1 %2419, %v525_v3   ;;  %v323_v18 = vpop.permute.xlu0 %322 }
  0xb7   : > { %v328_v36 = vpop.permute.xlu1 %327 }
  0xb8   : > { %561 = vperm.xlu1 %2419, %v527_v1   ;;  %v333_v37 = vpop.permute.xlu0 %332 }
  0xb9   : > { %2116 = vmatmul.mubr.msk.bf16.gmra.mrb[4].mxu0 %vm375_vm2, %v2541_v5 }
  0xba   : > { %440 = vmatprep.mubr.bf16.mxu0 %v2764_v0 }
  0xbc   : > { %1003 = vperm.xlu1 %2419, %v2163_v2  }
  0xc0   : > { %1013 = vperm.xlu1 %2419, %v2165_v16  }
  0xc1   : > { %2117 = vmatmul.mubr.msk.bf16.gmra.mrb[8].mxu0 %vm375_vm2, %v2542_v14 }
  0xc2   : > { %450 = vmatprep.mubr.bf16.mxu0 %v2764_v0 }
  0xc4   : > { %1458 = vperm.xlu1 %2419, %v2211_v45  }
  0xc8   : > { %1468 = vperm.xlu1 %2419, %v2213_v47  }
  0xc9   : > { %2118 = vmatmul.mubr.msk.bf16.gmra.mrb[12].mxu0 %vm375_vm2, %v2543_v46 }
  0xca   : > { %870 = vmatprep.mubr.bf16.mxu0 %v2764_v0 }
  0xcc   : > { %1909 = vperm.xlu1 %2419, %v2259_v48  }
  0xd0   : > { %1919 = vperm.xlu1 %2419, %v2261_v49  }
 0x184   : > { %v422_v50 = vpop.f32.mrb[0].mxu0 }
 0x185   : > { %v424_v51 = vpop.f32.mrb[1].mxu0  ;;  %v423_v22 = vadd.f32 %v422_v50, %v318_v17 }
 0x186   : > { %v426_v52 = vpop.f32.mrb[2].mxu0  ;;  %v425_v24 = vadd.f32 %v424_v51, %v318_v17 }
 0x187   : > { %v428_v53 = vpop.f32.mrb[3].mxu0  ;;  %v427_v26 = vadd.f32 %v426_v52, %v323_v18 }
 0x188   : > { %v429_v27 = vadd.f32 %v428_v53, %v323_v18 }
 0x18c   : > { %v432_v56 = vpop.f32.mrb[4].mxu0 }
 0x18d   : > { %v434_v57 = vpop.f32.mrb[5].mxu0  ;;  %v433_v40 = vadd.f32 %v432_v56, %v328_v36 }
 0x18e   : > { %v436_v58 = vpop.f32.mrb[6].mxu0  ;;  %v435_v41 = vadd.f32 %v434_v57, %v328_v36 }
 0x18f   : > { %v438_v59 = vpop.f32.mrb[7].mxu0  ;;  %v437_v3 = vadd.f32 %v436_v58, %v333_v37 }
 0x190   : > { %v439_v1 = vadd.f32 %v438_v59, %v333_v37 }
 0x194   : > { %v442_v62 = vpop.f32.mrb[8].mxu0 }
 0x195   : > { %v443_v63 = vadd.f32 %v442_v62, %v338_v55  ;;  %v444_v4 = vpop.f32.mrb[9].mxu0 }
 0x196   : > { %v445_v8 = vadd.f32 %v444_v4, %v338_v55  ;;  %v446_v11 = vpop.f32.mrb[10].mxu0 }
 0x197   : > { %v469_v12 = vmul.f32 0.5, %v443_v63  ;;  %v447_v13 = vadd.f32 %v446_v11, %v343_v54  ;;  %v448_v15 = vpop.f32.mrb[11].mxu0 }
 0x198   : > { %v470_v19 = vmul.f32 0.5, %v445_v8  ;;  %v449_v20 = vadd.f32 %v448_v15, %v343_v54 }
 0x199   : > { %2572 = vtanh.f32 %v469_v12  ;;  %v471_v23 = vmul.f32 0.5, %v447_v13 }
 0x19a   : > { %2574 = vtanh.f32 %v470_v19  ;;  %v472_v25 = vmul.f32 0.5, %v449_v20 }
 0x19b   : > { %2576 = vtanh.f32 %v471_v23 }
 0x19c   : > { %2578 = vtanh.f32 %v472_v25  ;;  %v452_v28 = vpop.f32.mrb[12].mxu0 }
 0x19d   : > { %2580 = vtanh.f32 %v423_v22  ;;  %v453_v29 = vadd.f32 %v452_v28, %v348_v60  ;;  %v454_v30 = vpop.f32.mrb[13].mxu0 }
 0x19e   : > { %2582 = vtanh.f32 %v425_v24  ;;  %v455_v31 = vadd.f32 %v454_v30, %v348_v60  ;;  %v456_v32 = vpop.f32.mrb[14].mxu0 }
 0x19f   : > { %2584 = vtanh.f32 %v427_v26  ;;  %v473_v33 = vmul.f32 0.5, %v453_v29  ;;  %v457_v34 = vadd.f32 %v456_v32, %v353_v61  ;;  %v458_v35 = vpop.f32.mrb[15].mxu0  ;;  %v2544_v32 = vld [vmem:[%s3544_s3] sm:$0xff]  }
 0x1a0   : > { %2586 = vtanh.f32 %v429_v27  ;;  %v474_v38 = vmul.f32 0.5, %v455_v31  ;;  %v459_v39 = vadd.f32 %v458_v35, %v353_v61  ;;  %v532_v35 = vpop.permute.xlu1 %531 }
 0x1a1   : > { %2588 = vtanh.f32 %v473_v33  ;;  %v475_v21 = vmul.f32 0.5, %v457_v34  ;;  %v2545_v33 = vld [vmem:[%s3544_s3 + $0x8] sm:$0xff]  }
 0x1a2   : > { %2590 = vtanh.f32 %v474_v38  ;;  %v476_v43 = vmul.f32 0.5, %v459_v39  ;;  %v537_v39 = vpop.permute.xlu0 %536 }
 0x1a3   : > { %v2573_v44 = vpop.eup %2572  ;;  %2592 = vtanh.f32 %v475_v21 }
 0x1a4   : > { %v2575_v5 = vpop.eup %2574  ;;  %v485_v2 = vadd.f32 1.0, %v2573_v44  ;;  %2594 = vtanh.f32 %v476_v43 }
 0x1a5   : > { %v2577_v14 = vpop.eup %2576  ;;  %2596 = vtanh.f32 %v433_v40  ;;  %v486_v16 = vadd.f32 1.0, %v2575_v5  ;;  %v542_v5 = vpop.permute.xlu1 %541 }
 0x1a6   : > { %v2579_v45 = vpop.eup %2578  ;;  %2598 = vtanh.f32 %v435_v41  ;;  %v493_v46 = vmul.f32 0.5, %v485_v2  ;;  %v487_v47 = vadd.f32 1.0, %v2577_v14 }
 0x1a7   : > { %v2581_v48 = vpop.eup %2580  ;;  %2600 = vtanh.f32 %v437_v3  ;;  %v488_v49 = vadd.f32 1.0, %v2579_v45  ;;  %v494_v50 = vmul.f32 0.5, %v486_v16  ;;  %v547_v16 = vpop.permute.xlu0 %546 }
 0x1a8   : > { %v2583_v51 = vpop.eup %2582  ;;  %2602 = vtanh.f32 %v439_v1  ;;  %v495_v52 = vmul.f32 0.5, %v487_v47  ;;  %v501_v53 = vmul.f32 %v2581_v48, %v493_v46 }
 0x1a9   : > { %v2585_v54 = vpop.eup %2584  ;;  %v496_v55 = vmul.f32 0.5, %v488_v49  ;;  %v502_v56 = vmul.f32 %v2583_v51, %v494_v50  ;;  %v2547_v49 = vld [vmem:[%s3544_s3 + $0x18] sm:$0xff]   ;;  %v2136_v50 = vld [vmem:[%s3543_s2 + $0x48] sm:$0xff] }
 0x1aa   : > { %v2587_v57 = vpop.eup %2586  ;;  %v503_v58 = vmul.f32 %v2585_v54, %v495_v52  ;;  %v2138_v51 = vld [vmem:[%s3543_s2 + $0x58] sm:$0xff]  ;;  %v2160_v52 = vld [vmem:[%s3545_s4 + $0x48] sm:$0xff]  ;;  %v2422_v54 = vpop.permute.xlu1 %2421 }
 0x1ab   : > { %v2589_v59 = vpop.eup %2588  ;;  %v504_v60 = vmul.f32 %v2587_v57, %v496_v55  ;;  %v2424_v55 = vunpack.i.h.bf16 %v2422_v54 }
 0x1ac   : > { %v2591_v61 = vpop.eup %2590  ;;  %v489_v62 = vadd.f32 1.0, %v2589_v59  ;;  %v517_v63 = vpack.c.bf16 %v503_v58, %v501_v53  ;;  %v2162_v53 = vld [vmem:[%s3545_s4 + $0x58] sm:$0xff] }
 0x1ad   : > { %v2593_v4 = vpop.eup %2592  ;;  %v490_v8 = vadd.f32 1.0, %v2591_v61  ;;  %v518_v11 = vpack.c.bf16 %v504_v60, %v502_v56  ;;  %v2423_v56 = vunpack.i.l.bf16 %v2422_v54 }
 0x1ae   : > { %v2595_v12 = vpop.eup %2594  ;;  %v497_v13 = vmul.f32 0.5, %v489_v62  ;;  %v491_v15 = vadd.f32 1.0, %v2593_v4  ;;  %v2427_v58 = vpop.permute.xlu1 %2426 }
 0x1af   : > { %v2597_v17 = vpop.eup %2596  ;;  %v498_v18 = vmul.f32 0.5, %v490_v8  ;;  %v492_v19 = vadd.f32 1.0, %v2595_v12  ;;  %602 = vmatprep.subr.bf16.mxu1 %v518_v11  ;;  %v2429_v12 = vunpack.i.h.bf16 %v2427_v58 }
 0x1b0   : > { %v2599_v20 = vpop.eup %2598  ;;  %v499_v22 = vmul.f32 0.5, %v491_v15  ;;  %603 = vmatpush1.bf16.msra.mxu1 %v517_v63  ;;  %v505_v23 = vmul.f32 %v2597_v17, %v497_v13  ;;  %v2428_v13 = vunpack.i.l.bf16 %v2427_v58 }
 0x1b1   : > { %v2601_v24 = vpop.eup %2600  ;;  %v500_v25 = vmul.f32 0.5, %v492_v19  ;;  %v506_v26 = vmul.f32 %v2599_v20, %v498_v18 }
 0x1b2   : > { %v2603_v27 = vpop.eup %2602  ;;  %v507_v28 = vmul.f32 %v2601_v24, %v499_v22  ;;  %v2432_v15 = vpop.permute.xlu1 %2431 }
 0x1b3   : > { %v508_v29 = vmul.f32 %v2603_v27, %v500_v25  ;;  %v2434_v20 = vunpack.i.h.bf16 %v2432_v15  ;;  %v2433_v22 = vunpack.i.l.bf16 %v2432_v15 }
 0x1b4   : > { %v519_v30 = vpack.c.bf16 %v507_v28, %v505_v23 }
 0x1b5   : > { %v520_v31 = vpack.c.bf16 %v508_v29, %v506_v26 }
 0x1b7   : > { %604 = vmatprep.subr.bf16.mxu1 %v520_v31 }
 0x1b8   : > { %605 = vmatpush1.bf16.msra.mxu1 %v519_v30  ;;  %v2452_v30 = vpop.permute.xlu1 %2451 }
 0x1bb   : > { %2123 = vmatmul.mubr.msk.bf16.vlgmr.msra.gmra.mrb[0].mxu1 %vm589_vm3, %v2544_v32 }
 0x1bc   : > { %644 = vmatprep.mubr.bf16.mxu1 %v2764_v0 }
 0x1c3   : > { %2124 = vmatmul.mubr.msk.bf16.gmra.mrb[4].mxu1 %vm589_vm3, %v2545_v33  ;;  %v2454_v33 = vunpack.i.h.bf16 %v2452_v30 }
 0x1c4   : > { %654 = vmatprep.mubr.bf16.mxu1 %v2764_v0 }
 0x28e   : > { %v636_v34 = vpop.f32.mrb[0].mxu1 }
 0x28f   : > { %v638_v36 = vpop.f32.mrb[1].mxu1  ;;  %v2453_v34 = vunpack.i.l.bf16 %v2452_v30 }
 0x290   : > { %v639_v37 = vadd.f32 %v638_v36, %v532_v35  ;;  %v640_v38 = vpop.f32.mrb[2].mxu1 }
 0x291   : > { %v642_v40 = vpop.f32.mrb[3].mxu1 }
 0x292   : > { %v643_v21 = vadd.f32 %v642_v40, %v537_v39  ;;  %v3102_v41 = vadd.f32 %v639_v37, %v2877_v9  ;;  %v2546_v9 = vld [vmem:[%s3544_s3 + $0x10] sm:$0xff]  }
 0x293   : > { %2125 = vmatmul.mubr.msk.bf16.gmra.mrb[8].mxu1 %vm589_vm3, %v2546_v9 }
 0x294   : > { %v3105_v43 = vadd.f32 %v643_v21, %v2879_v10  ;;  %662 = vmatprep.mubr.bf16.mxu1 %v2764_v0 }
 0x296   : > { %v646_v44 = vpop.f32.mrb[4].mxu1  ;;  %v2435_v3 = vpack.i.bf16 %v3105_v43, %v3102_v41 }
 0x297   : > { %v648_v1 = vpop.f32.mrb[5].mxu1 }
 0x298   : > { %v649_v2 = vadd.f32 %v648_v1, %v542_v5  ;;  %v650_v14 = vpop.f32.mrb[6].mxu1  ;;  %2436 = vrot.lane.b32.xlu0 %v2435_v3, %s2768_s8 }
 0x299   : > { %v652_v45 = vpop.f32.mrb[7].mxu1 }
 0x29a   : > { %v653_v46 = vadd.f32 %v652_v45, %v547_v16  ;;  %v3114_v10 = vadd.f32 %v649_v2, %v2871_v6  ;;  %v2140_v6 = vld [vmem:[%s3543_s2 + $0x68] sm:$0xff] }
 0x29b   : > { %2126 = vmatmul.mubr.msk.bf16.gmra.mrb[12].mxu1 %vm589_vm3, %v2547_v49  ;;  %v2548_v49 = vld [vmem:[%s3542_s1 + $0x20] sm:$0xff]  }
 0x29c   : > { %v3117_v47 = vadd.f32 %v653_v46, %v2873_v7  ;;  %900 = vmatprep.mubr.bf16.mxu1 %v2764_v0  ;;  %v2142_v7 = vld [vmem:[%s3543_s2 + $0x78] sm:$0xff]  ;;  %v745_v46 = vpack.c.bf16 %v3105_v43, %v3102_v41 }
 0x29e   : > { %v2440_v48 = vpack.i.bf16 %v3117_v47, %v3114_v10  ;;  %v747_v9 = vpack.c.bf16 %v3117_v47, %v3114_v10 }
 0x2a0   : > { %2441 = vrot.lane.b32.xlu0 %v2440_v48, %s2768_s8 }
 0x2a4   : > { %2446 = vrot.lane.b32.xlu0 %v2435_v3, %s2765_s10 }
 0x2a8   : > { %2456 = vrot.lane.b32.xlu0 %v2440_v48, %s2765_s10  ;;  %v2771_v48 = vmov 0.0|0.0  }
 0x2ac   : > { %793 = vperm.xlu0 %2418, %v2140_v6   ;;  %v2549_v6 = vld [vmem:[%s3542_s1 + $0x38] sm:$0xff]  }
 0x2b0   : > { %803 = vperm.xlu0 %2418, %v2142_v7   ;;  %v2550_v7 = vld [vmem:[%s3542_s1 + $0x28] sm:$0xff]  }
 0x2b4   : > { %773 = vperm.xlu0 %2418, %v2136_v50   ;;  %v2551_v50 = vld [vmem:[%s3542_s1 + $0x30] sm:$0xff]  }
 0x2b8   : > { %783 = vperm.xlu0 %2418, %v2138_v51   ;;  %v789_v51 = vpop.permute.xlu1 %788 }
 0x2bc   : > { %988 = vperm.xlu0 %2418, %v2160_v52  }
 0x2c0   : > { %998 = vperm.xlu0 %2418, %v2162_v53   ;;  %v799_v53 = vpop.permute.xlu1 %798 }
 0x30a   : > { %v2437_v57 = vpop.permute.xlu0 %2436 }
 0x30b   : > { %v2439_v59 = vunpack.i.h.bf16 %v2437_v57  ;;  %v2438_v60 = vunpack.i.l.bf16 %v2437_v57 }
 0x30d   : > { %v709_v61 = vsel %vm703_vm4, %v2439_v59, %v2424_v55  ;;  %v708_v62 = vsel %vm703_vm4, %v2438_v60, %v2423_v56  ;;  %v704_v63 = vsel %vm703_vm4, %v2423_v56, %v2438_v60  ;;  %v705_v4 = vsel %vm703_vm4, %v2424_v55, %v2439_v59  ;;  %v769_v55 = vpop.permute.xlu1 %768 }
 0x30e   : > { %v736_v8 = vpack.c.bf16 %v709_v61, %v708_v62  ;;  %v737_v11 = vpack.c.bf16 %v705_v4, %v704_v63 }
 0x310   : > { %838 = vmatprep.subr.bf16.mxu0 %v737_v11  ;;  %2278 = vmatprep.subr.bf16.mxu1 %v737_v11 }
 0x311   : > { %839 = vmatpush1.bf16.msra.mxu0 %v736_v8  ;;  %2284 = vmatpush1.bf16.msra.mxu1 %v736_v8 }
 0x312   : > { %v2442_v17 = vpop.permute.xlu0 %2441 }
 0x313   : > { %v2444_v18 = vunpack.i.h.bf16 %v2442_v17  ;;  %v2443_v19 = vunpack.i.l.bf16 %v2442_v17 }
 0x315   : > { %v711_v23 = vsel %vm703_vm4, %v2444_v18, %v2429_v12  ;;  %v710_v24 = vsel %vm703_vm4, %v2443_v19, %v2428_v13  ;;  %v706_v25 = vsel %vm703_vm4, %v2428_v13, %v2443_v19  ;;  %v707_v26 = vsel %vm703_vm4, %v2429_v12, %v2444_v18 }
 0x316   : > { %v738_v27 = vpack.c.bf16 %v711_v23, %v710_v24  ;;  %v2447_v28 = vpop.permute.xlu0 %2446  ;;  %v739_v29 = vpack.c.bf16 %v707_v26, %v706_v25 }
 0x317   : > { %v2449_v31 = vunpack.i.h.bf16 %v2447_v28  ;;  %v2448_v32 = vunpack.i.l.bf16 %v2447_v28 }
 0x318   : > { %840 = vmatprep.subr.bf16.mxu0 %v739_v29  ;;  %2279 = vmatprep.subr.bf16.mxu1 %v739_v29 }
 0x319   : > { %v733_v35 = vsel %vm253_vm0, %v2449_v31, %v2434_v20  ;;  %v732_v36 = vsel %vm253_vm0, %v2448_v32, %v2433_v22  ;;  %841 = vmatpush1.bf16.msra.mxu0 %v738_v27  ;;  %2285 = vmatpush1.bf16.msra.mxu1 %v738_v27  ;;  %v728_v37 = vsel %vm253_vm0, %v2433_v22, %v2448_v32 }
 0x31a   : > { %v740_v38 = vpack.c.bf16 %v733_v35, %v732_v36  ;;  %v2457_v39 = vpop.permute.xlu0 %2456  ;;  %v729_v40 = vsel %vm253_vm0, %v2434_v20, %v2449_v31  ;;  %v779_v20 = vpop.permute.xlu1 %778 }
 0x31b   : > { %v2459_v21 = vunpack.i.h.bf16 %v2457_v39  ;;  %v2458_v44 = vunpack.i.l.bf16 %v2457_v39  ;;  %v741_v3 = vpack.c.bf16 %v729_v40, %v728_v37 }
 0x31d   : > { %v735_v5 = vsel %vm253_vm0, %v2459_v21, %v2454_v33  ;;  %v734_v1 = vsel %vm253_vm0, %v2458_v44, %v2453_v34  ;;  %842 = vmatprep.subr.bf16.mxu0 %v741_v3  ;;  %2280 = vmatprep.subr.bf16.mxu1 %v741_v3  ;;  %v730_v2 = vsel %vm253_vm0, %v2453_v34, %v2458_v44 }
 0x31e   : > { %v742_v14 = vpack.c.bf16 %v735_v5, %v734_v1  ;;  %843 = vmatpush1.bf16.msra.mxu0 %v740_v38  ;;  %2286 = vmatpush1.bf16.msra.mxu1 %v740_v38  ;;  %v731_v16 = vsel %vm253_vm0, %v2454_v33, %v2459_v21 }
 0x31f   : > { %v743_v45 = vpack.c.bf16 %v731_v16, %v730_v2 }
 0x321   : > { %844 = vmatprep.subr.bf16.mxu0 %v743_v45  ;;  %2281 = vmatprep.subr.bf16.mxu1 %v743_v45 }
 0x322   : > { %845 = vmatpush1.bf16.msra.mxu0 %v742_v14  ;;  %2287 = vmatpush1.bf16.msra.mxu1 %v742_v14 }
 0x323   : > { %846 = vmatprep.subr.bf16.mxu0 %v745_v46  ;;  %2282 = vmatprep.subr.bf16.mxu1 %v745_v46 }
 0x326   : > { %847 = vmatpush1.bf16.msra.mxu0 %v2771_v48  ;;  %2288 = vmatpush1.bf16.msra.mxu1 %v2771_v48 }
 0x327   : > { %848 = vmatprep.subr.bf16.mxu0 %v747_v9  ;;  %2283 = vmatprep.subr.bf16.mxu1 %v747_v9 }
 0x32a   : > { %849 = vmatpush1.bf16.msra.mxu0 %v2771_v48  ;;  %2289 = vmatpush1.bf16.msra.mxu1 %v2771_v48 }
 0x32b   : > { %v794_v52 = vpop.permute.xlu0 %793 }
 0x32d   : > { %2147 = vmatmul.mubr.msk.bf16.vlgmr.msra.gmra.mrb[16].mxu0 %vm375_vm2, %v2548_v49  ;;  %2150 = vmatmul.mubr.msk.bf16.vlgmr.msra.gmra.mrb[16].mxu1 %vm375_vm2, %v2549_v6 }
 0x32e   : > { %880 = vmatprep.mubr.bf16.mxu0 %v2764_v0  ;;  %1085 = vmatprep.mubr.bf16.mxu1 %v2764_v0 }
 0x32f   : > { %v804_v54 = vpop.permute.xlu0 %803 }
 0x333   : > { %v774_v13 = vpop.permute.xlu0 %773 }
 0x335   : > { %2148 = vmatmul.mubr.msk.bf16.gmra.mrb[20].mxu0 %vm375_vm2, %v2550_v7 }
 0x336   : > { %890 = vmatprep.mubr.bf16.mxu0 %v2764_v0 }
 0x337   : > { %v784_v25 = vpop.permute.xlu0 %783 }
 0x33d   : > { %2149 = vmatmul.mubr.msk.bf16.gmra.mrb[24].mxu0 %vm375_vm2, %v2551_v50 }
 0x33e   : > { %1325 = vmatprep.mubr.bf16.mxu0 %v2764_v0 }
 0x400   : > { %v872_v56 = vpop.f32.mrb[16].mxu0  ;;  %v902_v57 = vpop.f32.mrb[16].mxu1 }
 0x401   : > { %v903_v58 = vadd.f32 %v902_v57, %v799_v53  ;;  %v874_v59 = vpop.f32.mrb[17].mxu0  ;;  %v904_v60 = vpop.f32.mrb[17].mxu1  ;;  %v873_v21 = vadd.f32 %v872_v56, %v769_v55 }
 0x402   : > { %v905_v61 = vadd.f32 %v904_v60, %v799_v53  ;;  %v876_v62 = vpop.f32.mrb[18].mxu0  ;;  %v906_v63 = vpop.f32.mrb[18].mxu1  ;;  %v875_v16 = vadd.f32 %v874_v59, %v769_v55 }
 0x403   : > { %v923_v4 = vmul.f32 0.5, %v903_v58  ;;  %v907_v8 = vadd.f32 %v906_v63, %v804_v54  ;;  %v878_v11 = vpop.f32.mrb[19].mxu0  ;;  %v908_v12 = vpop.f32.mrb[19].mxu1  ;;  %v877_v57 = vadd.f32 %v876_v62, %v774_v13 }
 0x404   : > { %v924_v15 = vmul.f32 0.5, %v905_v61  ;;  %v909_v17 = vadd.f32 %v908_v12, %v804_v54  ;;  %v879_v63 = vadd.f32 %v878_v11, %v774_v13 }
 0x405   : > { %2604 = vtanh.f32 %v923_v4  ;;  %v925_v18 = vmul.f32 0.5, %v907_v8 }
 0x406   : > { %2606 = vtanh.f32 %v924_v15  ;;  %v926_v19 = vmul.f32 0.5, %v909_v17 }
 0x407   : > { %2608 = vtanh.f32 %v925_v18 }
 0x408   : > { %v882_v22 = vpop.f32.mrb[20].mxu0  ;;  %2610 = vtanh.f32 %v926_v19 }
 0x409   : > { %v883_v23 = vadd.f32 %v882_v22, %v779_v20  ;;  %v884_v24 = vpop.f32.mrb[21].mxu0 }
 0x40a   : > { %v885_v26 = vadd.f32 %v884_v24, %v779_v20  ;;  %v886_v27 = vpop.f32.mrb[22].mxu0 }
 0x40b   : > { %2612 = vtanh.f32 %v883_v23  ;;  %v887_v28 = vadd.f32 %v886_v27, %v784_v25  ;;  %v888_v29 = vpop.f32.mrb[23].mxu0 }
 0x40c   : > { %2614 = vtanh.f32 %v885_v26  ;;  %v889_v30 = vadd.f32 %v888_v29, %v784_v25 }
 0x40d   : > { %2616 = vtanh.f32 %v887_v28 }
 0x40e   : > { %2618 = vtanh.f32 %v889_v30 }
 0x40f   : > { %v2605_v31 = vpop.eup %2604 }
 0x410   : > { %v2607_v32 = vpop.eup %2606  ;;  %v939_v33 = vadd.f32 1.0, %v2605_v31  ;;  %v892_v34 = vpop.f32.mrb[24].mxu0 }
 0x411   : > { %v940_v35 = vadd.f32 1.0, %v2607_v32  ;;  %v893_v36 = vadd.f32 %v892_v34, %v789_v51  ;;  %v894_v37 = vpop.f32.mrb[25].mxu0  ;;  %v2609_v38 = vpop.eup %2608  ;;  %v2552_v34 = vld [vmem:[%s3544_s3 + $0x20] sm:$0xff]  }
 0x412   : > { %v895_v39 = vadd.f32 %v894_v37, %v789_v51  ;;  %v896_v40 = vpop.f32.mrb[26].mxu0  ;;  %v941_v44 = vadd.f32 1.0, %v2609_v38  ;;  %v2611_v2 = vpop.eup %2610  ;;  %v947_v14 = vmul.f32 0.5, %v939_v33 }
 0x413   : > { %v919_v3 = vmul.f32 0.5, %v893_v36  ;;  %v897_v5 = vadd.f32 %v896_v40, %v794_v52  ;;  %v898_v1 = vpop.f32.mrb[27].mxu0  ;;  %v948_v49 = vmul.f32 0.5, %v940_v35  ;;  %v942_v6 = vadd.f32 1.0, %v2611_v2  ;;  %v2553_v35 = vld [vmem:[%s3544_s3 + $0x28] sm:$0xff]   ;;  %v984_v37 = vpop.permute.xlu1 %983 }
 0x414   : > { %v920_v45 = vmul.f32 0.5, %v895_v39  ;;  %v899_v46 = vadd.f32 %v898_v1, %v794_v52  ;;  %v949_v53 = vmul.f32 0.5, %v941_v44 }
 0x415   : > { %v2613_v9 = vpop.eup %2612  ;;  %2620 = vtanh.f32 %v919_v3  ;;  %v921_v7 = vmul.f32 0.5, %v897_v5  ;;  %v950_v58 = vmul.f32 0.5, %v942_v6 }
 0x416   : > { %v2615_v50 = vpop.eup %2614  ;;  %2622 = vtanh.f32 %v920_v45  ;;  %v922_v51 = vmul.f32 0.5, %v899_v46  ;;  %v955_v54 = vmul.f32 %v2613_v9, %v947_v14 }
 0x417   : > { %v2617_v56 = vpop.eup %2616  ;;  %2624 = vtanh.f32 %v921_v7  ;;  %v956_v60 = vmul.f32 %v2615_v50, %v948_v49 }
 0x418   : > { %v2619_v61 = vpop.eup %2618  ;;  %2626 = vtanh.f32 %v922_v51  ;;  %v957_v55 = vmul.f32 %v2617_v56, %v949_v53  ;;  %v2188_v53 = vld [vmem:[%s3543_s2 + $0xa8] sm:$0xff]  ;;  %v2186_v51 = vld [vmem:[%s3543_s2 + $0x98] sm:$0xff] }
 0x419   : > { %2628 = vtanh.f32 %v873_v21  ;;  %v958_v52 = vmul.f32 %v2619_v61, %v950_v58  ;;  %v989_v21 = vpop.permute.xlu0 %988  ;;  %v2210_v56 = vld [vmem:[%s3545_s4 + $0x98] sm:$0xff] }
 0x41a   : > { %2630 = vtanh.f32 %v875_v16  ;;  %v970_v59 = vpack.c.bf16 %v957_v55, %v955_v54  ;;  %v994_v16 = vpop.permute.xlu1 %993  ;;  %v2208_v54 = vld [vmem:[%s3545_s4 + $0x88] sm:$0xff] }
 0x41b   : > { %2632 = vtanh.f32 %v877_v57  ;;  %v971_v4 = vpack.c.bf16 %v958_v52, %v956_v60 }
 0x41c   : > { %2634 = vtanh.f32 %v879_v63 }
 0x41d   : > { %v999_v49 = vpop.permute.xlu0 %998 }
 0x41e   : > { %v2462_v57 = vpop.permute.xlu1 %2461 }
 0x41f   : > { %v2621_v8 = vpop.eup %2620  ;;  %v2464_v58 = vunpack.i.h.bf16 %v2462_v57  ;;  %v2463_v60 = vunpack.i.l.bf16 %v2462_v57 }
 0x420   : > { %v2623_v12 = vpop.eup %2622  ;;  %v935_v15 = vadd.f32 1.0, %v2621_v8 }
 0x421   : > { %v2625_v17 = vpop.eup %2624  ;;  %v936_v18 = vadd.f32 1.0, %v2623_v12 }
 0x422   : > { %v2627_v62 = vpop.eup %2626  ;;  %v943_v19 = vmul.f32 0.5, %v935_v15  ;;  %v937_v20 = vadd.f32 1.0, %v2625_v17  ;;  %v2467_v63 = vpop.permute.xlu1 %2466 }
 0x423   : > { %v2629_v22 = vpop.eup %2628  ;;  %v944_v23 = vmul.f32 0.5, %v936_v18  ;;  %v938_v11 = vadd.f32 1.0, %v2627_v62  ;;  %v2469_v18 = vunpack.i.h.bf16 %v2467_v63  ;;  %v2468_v62 = vunpack.i.l.bf16 %v2467_v63 }
 0x424   : > { %v2631_v13 = vpop.eup %2630  ;;  %v951_v24 = vmul.f32 %v2629_v22, %v943_v19  ;;  %v945_v25 = vmul.f32 0.5, %v937_v20 }
 0x425   : > { %v2633_v26 = vpop.eup %2632  ;;  %v946_v27 = vmul.f32 0.5, %v938_v11  ;;  %v952_v28 = vmul.f32 %v2631_v13, %v944_v23 }
 0x426   : > { %v2635_v29 = vpop.eup %2634  ;;  %v953_v30 = vmul.f32 %v2633_v26, %v945_v25  ;;  %v2472_v19 = vpop.permute.xlu1 %2471 }
 0x427   : > { %v954_v31 = vmul.f32 %v2635_v29, %v946_v27  ;;  %v2474_v11 = vunpack.i.h.bf16 %v2472_v19  ;;  %v2473_v13 = vunpack.i.l.bf16 %v2472_v19 }
 0x428   : > { %v968_v32 = vpack.c.bf16 %v953_v30, %v951_v24 }
 0x429   : > { %v969_v33 = vpack.c.bf16 %v954_v31, %v952_v28 }
 0x42a   : > { %v2492_v31 = vpop.permute.xlu1 %2491 }
 0x42b   : > { %1053 = vmatprep.subr.bf16.mxu1 %v969_v33 }
 0x42c   : > { %1054 = vmatpush1.bf16.msra.mxu1 %v968_v32 }
 0x42d   : > { %1055 = vmatprep.subr.bf16.mxu1 %v971_v4 }
 0x430   : > { %1056 = vmatpush1.bf16.msra.mxu1 %v970_v59 }
 0x433   : > { %2171 = vmatmul.mubr.msk.bf16.vlgmr.msra.gmra.mrb[20].mxu1 %vm589_vm3, %v2552_v34  ;;  %v2494_v34 = vunpack.i.h.bf16 %v2492_v31 }
 0x434   : > { %1095 = vmatprep.mubr.bf16.mxu1 %v2764_v0 }
 0x43b   : > { %2172 = vmatmul.mubr.msk.bf16.gmra.mrb[24].mxu1 %vm589_vm3, %v2553_v35  ;;  %v2493_v35 = vunpack.i.l.bf16 %v2492_v31 }
 0x43c   : > { %1105 = vmatprep.mubr.bf16.mxu1 %v2764_v0 }
 0x506   : > { %v1087_v36 = vpop.f32.mrb[20].mxu1 }
 0x507   : > { %v1089_v38 = vpop.f32.mrb[21].mxu1 }
 0x508   : > { %v1090_v39 = vadd.f32 %v1089_v38, %v984_v37  ;;  %v1091_v40 = vpop.f32.mrb[22].mxu1 }
 0x509   : > { %v1093_v44 = vpop.f32.mrb[23].mxu1 }
 0x50a   : > { %v1094_v3 = vadd.f32 %v1093_v44, %v989_v21  ;;  %v3221_v5 = vadd.f32 %v1090_v39, %v3102_v41 }
 0x50c   : > { %v3224_v1 = vadd.f32 %v1094_v3, %v3105_v43 }
 0x50e   : > { %v1097_v2 = vpop.f32.mrb[24].mxu1  ;;  %v2475_v14 = vpack.i.bf16 %v3224_v1, %v3221_v5 }
 0x50f   : > { %v1099_v45 = vpop.f32.mrb[25].mxu1 }
 0x510   : > { %v1100_v46 = vadd.f32 %v1099_v45, %v994_v16  ;;  %v1101_v9 = vpop.f32.mrb[26].mxu1  ;;  %2476 = vrot.lane.b32.xlu0 %v2475_v14, %s2769_s26 }
 0x511   : > { %v1103_v6 = vpop.f32.mrb[27].mxu1 }
 0x512   : > { %v1104_v7 = vadd.f32 %v1103_v6, %v999_v49  ;;  %v3230_v50 = vadd.f32 %v1100_v46, %v3114_v10  ;;  %v2190_v10 = vld [vmem:[%s3543_s2 + $0xb8] sm:$0xff]  ;;  %v1200_v6 = vpack.c.bf16 %v3224_v1, %v3221_v5 }
 0x514   : > { %v3233_v41 = vadd.f32 %v1104_v7, %v3117_v47  ;;  %v2184_v47 = vld [vmem:[%s3543_s2 + $0x88] sm:$0xff] }
 0x516   : > { %v2480_v43 = vpack.i.bf16 %v3233_v41, %v3230_v50  ;;  %v1202_v7 = vpack.c.bf16 %v3233_v41, %v3230_v50 }
 0x518   : > { %2481 = vrot.lane.b32.xlu0 %v2480_v43, %s2769_s26 }
 0x51c   : > { %2486 = vrot.lane.b32.xlu0 %v2475_v14, %s2768_s8 }
 0x520   : > { %2496 = vrot.lane.b32.xlu0 %v2480_v43, %s2768_s8  ;;  %v2554_v43 = vld [vmem:[%s3542_s1 + $0x40] sm:$0xff]   ;;  %s2704_s8 = sshll.u32 %s2772_s16, 4  ;;  %s2705_s8 = int_to_ptr.vmem [resolvable:$false] %s2704_s8 }
 0x521   : > { %s2706_s17 = scalar_lea.vmem %s2705_s8, 1024  ;;  %p2707_p0 = scmp.lt.s32.totalorder %s3490_s11, %s2705_s8 }
 0x522   : > { %p2708_p1 = scmp.lt.s32.totalorder %s2706_s17, %s2700_s22 }
 0x524   : > { %1248 = vperm.xlu0 %2418, %v2188_v53   ;;  %v2555_v53 = vld [vmem:[%s3542_s1 + $0x48] sm:$0xff]   ;;  %p2709_p2 = por %p2708_p1, %p2707_p0 }
 0x526   : > { %p2710_p3 = pnand %p2709_p2, %p2703_p13 }
 0x528   : > { %1258 = vperm.xlu0 %2418, %v2190_v10   ;;  %v2556_v10 = vld [vmem:[%s3542_s1 + $0x50] sm:$0xff]  }
 0x52c   : > { %1228 = vperm.xlu0 %2418, %v2184_v47   ;;  %v2557_v47 = vld [vmem:[%s3542_s1 + $0x58] sm:$0xff]  }
 0x530   : > { %1238 = vperm.xlu0 %2418, %v2186_v51   ;;  %v2558_v51 = vld [vmem:[%s3544_s3 + $0x30] sm:$0xff]  }
 0x531   : > { %2173 = vmatmul.mubr.msk.bf16.gmra.mrb[8].mxu1 %vm589_vm3, %v2558_v51 }
 0x532   : > { %1113 = vmatprep.mubr.bf16.mxu1 %v2764_v0 }
 0x534   : > { %1443 = vperm.xlu0 %2418, %v2208_v54   ;;  %v2559_v54 = vld [vmem:[%s3544_s3 + $0x38] sm:$0xff]  }
 0x538   : > { %1453 = vperm.xlu0 %2418, %v2210_v56  }
 0x539   : > { %2174 = vmatmul.mubr.msk.bf16.gmra.mrb[12].mxu1 %vm589_vm3, %v2559_v54 }
 0x53a   : > { %1540 = vmatprep.mubr.bf16.mxu1 %v2764_v0 }
 0x582   : > { %v2477_v61 = vpop.permute.xlu0 %2476 }
 0x583   : > { %v2479_v55 = vunpack.i.h.bf16 %v2477_v61  ;;  %v2478_v52 = vunpack.i.l.bf16 %v2477_v61  ;;  %v1244_v61 = vpop.permute.xlu1 %1243 }
 0x585   : > { %v1164_v59 = vsel %vm1158_vm5, %v2479_v55, %v2464_v58  ;;  %v1163_v4 = vsel %vm1158_vm5, %v2478_v52, %v2463_v60  ;;  %v1159_v8 = vsel %vm1158_vm5, %v2463_v60, %v2478_v52  ;;  %v1160_v12 = vsel %vm1158_vm5, %v2464_v58, %v2479_v55 }
 0x586   : > { %v1191_v15 = vpack.c.bf16 %v1164_v59, %v1163_v4  ;;  %v1192_v17 = vpack.c.bf16 %v1160_v12, %v1159_v8 }
 0x587   : > { %v1254_v8 = vpop.permute.xlu1 %1253 }
 0x588   : > { %1293 = vmatprep.subr.bf16.mxu0 %v1192_v17 }
 0x589   : > { %1294 = vmatpush1.bf16.msra.mxu0 %v1191_v15 }
 0x58a   : > { %v2482_v20 = vpop.permute.xlu0 %2481 }
 0x58b   : > { %v2484_v22 = vunpack.i.h.bf16 %v2482_v20  ;;  %v2483_v23 = vunpack.i.l.bf16 %v2482_v20 }
 0x58d   : > { %v1166_v24 = vsel %vm1158_vm5, %v2484_v22, %v2469_v18  ;;  %v1165_v25 = vsel %vm1158_vm5, %v2483_v23, %v2468_v62  ;;  %v1161_v26 = vsel %vm1158_vm5, %v2468_v62, %v2483_v23  ;;  %v1162_v27 = vsel %vm1158_vm5, %v2469_v18, %v2484_v22 }
 0x58e   : > { %v1193_v28 = vpack.c.bf16 %v1166_v24, %v1165_v25  ;;  %v2487_v29 = vpop.permute.xlu0 %2486  ;;  %v1194_v30 = vpack.c.bf16 %v1162_v27, %v1161_v26 }
 0x58f   : > { %v2489_v32 = vunpack.i.h.bf16 %v2487_v29  ;;  %v2488_v33 = vunpack.i.l.bf16 %v2487_v29 }
 0x590   : > { %1295 = vmatprep.subr.bf16.mxu0 %v1194_v30 }
 0x591   : > { %v1188_v36 = vsel %vm703_vm4, %v2489_v32, %v2474_v11  ;;  %v1187_v37 = vsel %vm703_vm4, %v2488_v33, %v2473_v13  ;;  %1296 = vmatpush1.bf16.msra.mxu0 %v1193_v28  ;;  %v1183_v38 = vsel %vm703_vm4, %v2473_v13, %v2488_v33  ;;  %v1184_v39 = vsel %vm703_vm4, %v2474_v11, %v2489_v32  ;;  %v1224_v11 = vpop.permute.xlu1 %1223 }
 0x592   : > { %v1195_v40 = vpack.c.bf16 %v1188_v36, %v1187_v37  ;;  %v2497_v21 = vpop.permute.xlu0 %2496  ;;  %v1196_v44 = vpack.c.bf16 %v1184_v39, %v1183_v38 }
 0x593   : > { %v2499_v3 = vunpack.i.h.bf16 %v2497_v21  ;;  %v2498_v2 = vunpack.i.l.bf16 %v2497_v21 }
 0x594   : > { %1297 = vmatprep.subr.bf16.mxu0 %v1196_v44 }
 0x595   : > { %v1190_v14 = vsel %vm703_vm4, %v2499_v3, %v2494_v34  ;;  %v1189_v16 = vsel %vm703_vm4, %v2498_v2, %v2493_v35  ;;  %1298 = vmatpush1.bf16.msra.mxu0 %v1195_v40  ;;  %v1185_v45 = vsel %vm703_vm4, %v2493_v35, %v2498_v2  ;;  %v1186_v46 = vsel %vm703_vm4, %v2494_v34, %v2499_v3  ;;  %v1234_v40 = vpop.permute.xlu1 %1233 }
 0x596   : > { %v1197_v9 = vpack.c.bf16 %v1190_v14, %v1189_v16  ;;  %v1198_v49 = vpack.c.bf16 %v1186_v46, %v1185_v45 }
 0x598   : > { %1299 = vmatprep.subr.bf16.mxu0 %v1198_v49 }
 0x599   : > { %1300 = vmatpush1.bf16.msra.mxu0 %v1197_v9 }
 0x59a   : > { %1301 = vmatprep.subr.bf16.mxu0 %v1200_v6 }
 0x59d   : > { %1302 = vmatpush1.bf16.msra.mxu0 %v2771_v48 }
 0x59e   : > { %1303 = vmatprep.subr.bf16.mxu0 %v1202_v7 }
 0x5a1   : > { %1304 = vmatpush1.bf16.msra.mxu0 %v2771_v48 }
 0x5a3   : > { %v1249_v52 = vpop.permute.xlu0 %1248 }
 0x5a4   : > { %2195 = vmatmul.mubr.msk.bf16.vlgmr.msra.gmra.mrb[28].mxu0 %vm375_vm2, %v2554_v43 }
 0x5a5   : > { %1335 = vmatprep.mubr.bf16.mxu0 %v2764_v0 }
 0x5a7   : > { %v1259_v12 = vpop.permute.xlu0 %1258 }
 0x5ab   : > { %v1229_v27 = vpop.permute.xlu0 %1228 }
 0x5ac   : > { %2196 = vmatmul.mubr.msk.bf16.gmra.mrb[32].mxu0 %vm375_vm2, %v2555_v53 }
 0x5ad   : > { %1345 = vmatprep.mubr.bf16.mxu0 %v2764_v0 }
 0x5af   : > { %v1239_v14 = vpop.permute.xlu0 %1238 }
 0x5b4   : > { %2197 = vmatmul.mubr.msk.bf16.gmra.mrb[36].mxu0 %vm375_vm2, %v2556_v10 }
 0x5b5   : > { %1355 = vmatprep.mubr.bf16.mxu0 %v2764_v0 }
 0x5bc   : > { %2198 = vmatmul.mubr.msk.bf16.gmra.mrb[40].mxu0 %vm375_vm2, %v2557_v47 }
 0x5bd   : > { %1780 = vmatprep.mubr.bf16.mxu0 %v2764_v0 }
 0x677   : > { %v1327_v56 = vpop.f32.mrb[28].mxu0 }
 0x678   : > { %v1329_v57 = vpop.f32.mrb[29].mxu0  ;;  %v1328_v25 = vadd.f32 %v1327_v56, %v1224_v11 }
 0x679   : > { %v1331_v58 = vpop.f32.mrb[30].mxu0  ;;  %v1330_v28 = vadd.f32 %v1329_v57, %v1224_v11 }
 0x67a   : > { %v1333_v60 = vpop.f32.mrb[31].mxu0  ;;  %v1332_v30 = vadd.f32 %v1331_v58, %v1229_v27 }
 0x67b   : > { %v1334_v31 = vadd.f32 %v1333_v60, %v1229_v27 }
 0x67f   : > { %v1337_v63 = vpop.f32.mrb[32].mxu0 }
 0x680   : > { %v1339_v55 = vpop.f32.mrb[33].mxu0  ;;  %v1338_v3 = vadd.f32 %v1337_v63, %v1234_v40 }
 0x681   : > { %v1341_v59 = vpop.f32.mrb[34].mxu0  ;;  %v1340_v16 = vadd.f32 %v1339_v55, %v1234_v40  ;;  %v1439_v40 = vpop.permute.xlu1 %1438 }
 0x682   : > { %v1343_v4 = vpop.f32.mrb[35].mxu0  ;;  %v1342_v9 = vadd.f32 %v1341_v59, %v1239_v14 }
 0x683   : > { %v1344_v6 = vadd.f32 %v1343_v4, %v1239_v14 }
 0x687   : > { %v1347_v15 = vpop.f32.mrb[36].mxu0 }
 0x688   : > { %v1348_v17 = vadd.f32 %v1347_v15, %v1244_v61  ;;  %v1349_v18 = vpop.f32.mrb[37].mxu0 }
 0x689   : > { %v1350_v62 = vadd.f32 %v1349_v18, %v1244_v61  ;;  %v1351_v19 = vpop.f32.mrb[38].mxu0 }
 0x68a   : > { %v1374_v20 = vmul.f32 0.5, %v1348_v17  ;;  %v1352_v22 = vadd.f32 %v1351_v19, %v1249_v52  ;;  %v1353_v23 = vpop.f32.mrb[39].mxu0 }
 0x68b   : > { %v1375_v13 = vmul.f32 0.5, %v1350_v62  ;;  %v1354_v24 = vadd.f32 %v1353_v23, %v1249_v52 }
 0x68c   : > { %2636 = vtanh.f32 %v1374_v20  ;;  %v1376_v26 = vmul.f32 0.5, %v1352_v22 }
 0x68d   : > { %2638 = vtanh.f32 %v1375_v13  ;;  %v1377_v29 = vmul.f32 0.5, %v1354_v24 }
 0x68e   : > { %2640 = vtanh.f32 %v1376_v26 }
 0x68f   : > { %2642 = vtanh.f32 %v1377_v29  ;;  %v1357_v32 = vpop.f32.mrb[40].mxu0 }
 0x690   : > { %2644 = vtanh.f32 %v1328_v25  ;;  %v1358_v33 = vadd.f32 %v1357_v32, %v1254_v8  ;;  %v1359_v34 = vpop.f32.mrb[41].mxu0 }
 0x691   : > { %2646 = vtanh.f32 %v1330_v28  ;;  %v1360_v35 = vadd.f32 %v1359_v34, %v1254_v8  ;;  %v1361_v36 = vpop.f32.mrb[42].mxu0 }
 0x692   : > { %2648 = vtanh.f32 %v1332_v30  ;;  %v1378_v37 = vmul.f32 0.5, %v1358_v33  ;;  %v1362_v38 = vadd.f32 %v1361_v36, %v1259_v12  ;;  %v1363_v39 = vpop.f32.mrb[43].mxu0 }
 0x693   : > { %2650 = vtanh.f32 %v1334_v31  ;;  %v1379_v21 = vmul.f32 0.5, %v1360_v35  ;;  %v1364_v44 = vadd.f32 %v1363_v39, %v1259_v12 }
 0x694   : > { %2652 = vtanh.f32 %v1378_v37  ;;  %v1380_v2 = vmul.f32 0.5, %v1362_v38  ;;  %v2560_v37 = vld [vmem:[%s3544_s3 + $0x40] sm:$0xff]   ;;  %v2561_v38 = vld [vmem:[%s3544_s3 + $0x48] sm:$0xff]  }
 0x695   : > { %2654 = vtanh.f32 %v1379_v21  ;;  %v1381_v45 = vmul.f32 0.5, %v1364_v44 }
 0x696   : > { %v2637_v46 = vpop.eup %2636  ;;  %2656 = vtanh.f32 %v1380_v2  ;;  %v1444_v2 = vpop.permute.xlu0 %1443 }
 0x697   : > { %v2639_v49 = vpop.eup %2638  ;;  %v1390_v7 = vadd.f32 1.0, %v2637_v46  ;;  %2658 = vtanh.f32 %v1381_v45 }
 0x698   : > { %v2641_v43 = vpop.eup %2640  ;;  %2660 = vtanh.f32 %v1338_v3  ;;  %v1391_v53 = vadd.f32 1.0, %v2639_v49 }
 0x699   : > { %v2643_v10 = vpop.eup %2642  ;;  %2662 = vtanh.f32 %v1340_v16  ;;  %v1398_v47 = vmul.f32 0.5, %v1390_v7  ;;  %v1392_v51 = vadd.f32 1.0, %v2641_v43  ;;  %v1449_v7 = vpop.permute.xlu1 %1448 }
 0x69a   : > { %v2645_v54 = vpop.eup %2644  ;;  %2664 = vtanh.f32 %v1342_v9  ;;  %v1399_v56 = vmul.f32 0.5, %v1391_v53  ;;  %v1393_v57 = vadd.f32 1.0, %v2643_v10 }
 0x69b   : > { %v2647_v58 = vpop.eup %2646  ;;  %2666 = vtanh.f32 %v1344_v6  ;;  %v1406_v60 = vmul.f32 %v2645_v54, %v1398_v47  ;;  %v1400_v61 = vmul.f32 0.5, %v1392_v51  ;;  %v1454_v47 = vpop.permute.xlu0 %1453 }
 0x69c   : > { %v2649_v63 = vpop.eup %2648  ;;  %v1401_v55 = vmul.f32 0.5, %v1393_v57  ;;  %v1407_v52 = vmul.f32 %v2647_v58, %v1399_v56  ;;  %v2232_v58 = vld [vmem:[%s3543_s2 + $0xc8] sm:$0xff] }
 0x69d   : > { %v2651_v59 = vpop.eup %2650  ;;  %v1408_v4 = vmul.f32 %v2649_v63, %v1400_v61  ;;  %v526_v61 = vld [vmem:[%s3545_s4 + $0x28] sm:$0xff]  ;;  %v528_v63 = vld [vmem:[%s3545_s4 + $0x38] sm:$0xff] }
 0x69e   : > { %v2653_v8 = vpop.eup %2652  ;;  %v1409_v12 = vmul.f32 %v2651_v59, %v1401_v55  ;;  %v2164_v55 = vld [vmem:[%s3545_s4 + $0x68] sm:$0xff] }
 0x69f   : > { %v2655_v15 = vpop.eup %2654  ;;  %v1394_v17 = vadd.f32 1.0, %v2653_v8  ;;  %v1423_v18 = vpack.c.bf16 %v1408_v4, %v1406_v60  ;;  %v2234_v60 = vld [vmem:[%s3543_s2 + $0xd8] sm:$0xff]  ;;  %v2212_v59 = vld [vmem:[%s3545_s4 + $0xa8] sm:$0xff] }
 0x6a0   : > { %v2657_v62 = vpop.eup %2656  ;;  %v1395_v19 = vadd.f32 1.0, %v2655_v15  ;;  %v1424_v20 = vpack.c.bf16 %v1409_v12, %v1407_v52  ;;  %v2166_v52 = vld [vmem:[%s3545_s4 + $0x78] sm:$0xff]  ;;  %v2260_v8 = vld [vmem:[%s3545_s4 + $0xe8] sm:$0xff]  ;;  %v2502_v15 = vpop.permute.xlu1 %2501 }
 0x6a1   : > { %v2659_v22 = vpop.eup %2658  ;;  %v1402_v23 = vmul.f32 0.5, %v1394_v17  ;;  %v1396_v11 = vadd.f32 1.0, %v2657_v62  ;;  %v2214_v4 = vld [vmem:[%s3545_s4 + $0xb8] sm:$0xff]  ;;  %v2504_v17 = vunpack.i.h.bf16 %v2502_v15 }
 0x6a2   : > { %v2661_v13 = vpop.eup %2660  ;;  %v1403_v24 = vmul.f32 0.5, %v1395_v19  ;;  %v1397_v25 = vadd.f32 1.0, %v2659_v22  ;;  %1508 = vmatprep.subr.bf16.mxu1 %v1424_v20  ;;  %v2262_v12 = vld [vmem:[%s3545_s4 + $0xf8] sm:$0xff] }
 0x6a3   : > { %v2663_v26 = vpop.eup %2662  ;;  %v1410_v27 = vmul.f32 %v2661_v13, %v1402_v23  ;;  %v1404_v28 = vmul.f32 0.5, %v1396_v11  ;;  %1509 = vmatpush1.bf16.msra.mxu1 %v1423_v18  ;;  %v2503_v18 = vunpack.i.l.bf16 %v2502_v15 }
 0x6a4   : > { %v2665_v29 = vpop.eup %2664  ;;  %v1405_v30 = vmul.f32 0.5, %v1397_v25  ;;  %v1411_v31 = vmul.f32 %v2663_v26, %v1403_v24  ;;  %v2507_v19 = vpop.permute.xlu1 %2506 }
 0x6a5   : > { %v2667_v32 = vpop.eup %2666  ;;  %v1412_v33 = vmul.f32 %v2665_v29, %v1404_v28  ;;  %v2508_v28 = vunpack.i.l.bf16 %v2507_v19 }
 0x6a6   : > { %v1413_v34 = vmul.f32 %v2667_v32, %v1405_v30 }
 0x6a7   : > { %v1425_v35 = vpack.c.bf16 %v1412_v33, %v1410_v27  ;;  %v2509_v27 = vunpack.i.h.bf16 %v2507_v19 }
 0x6a8   : > { %v1426_v36 = vpack.c.bf16 %v1413_v34, %v1411_v31  ;;  %v2512_v29 = vpop.permute.xlu1 %2511 }
 0x6a9   : > { %v2514_v33 = vunpack.i.h.bf16 %v2512_v29  ;;  %v2513_v34 = vunpack.i.l.bf16 %v2512_v29 }
 0x6aa   : > { %1510 = vmatprep.subr.bf16.mxu1 %v1426_v36 }
 0x6ab   : > { %1511 = vmatpush1.bf16.msra.mxu1 %v1425_v35 }
 0x6ae   : > { %2219 = vmatmul.mubr.msk.bf16.vlgmr.msra.gmra.mrb[28].mxu1 %vm589_vm3, %v2560_v37 }
 0x6af   : > { %1550 = vmatprep.mubr.bf16.mxu1 %v2764_v0 }
 0x6b6   : > { %2220 = vmatmul.mubr.msk.bf16.gmra.mrb[32].mxu1 %vm589_vm3, %v2561_v38 }
 0x6b7   : > { %1560 = vmatprep.mubr.bf16.mxu1 %v2764_v0 }
 0x781   : > { %v1542_v39 = vpop.f32.mrb[28].mxu1 }
 0x782   : > { %v1544_v21 = vpop.f32.mrb[29].mxu1 }
 0x783   : > { %v1545_v44 = vadd.f32 %v1544_v21, %v1439_v40  ;;  %v1546_v3 = vpop.f32.mrb[30].mxu1 }
 0x784   : > { %v1548_v14 = vpop.f32.mrb[31].mxu1 }
 0x785   : > { %v1549_v16 = vadd.f32 %v1548_v14, %v1444_v2  ;;  %v3338_v45 = vadd.f32 %v1545_v44, %v3221_v5  ;;  %v2532_v44 = vpop.permute.xlu1 %2531 }
 0x786   : > { %v2534_v14 = vunpack.i.h.bf16 %v2532_v44 }
 0x787   : > { %v3341_v46 = vadd.f32 %v1549_v16, %v3224_v1  ;;  %v2533_v16 = vunpack.i.l.bf16 %v2532_v44 }
 0x789   : > { %v1552_v9 = vpop.f32.mrb[32].mxu1  ;;  %v2515_v49 = vpack.i.bf16 %v3341_v46, %v3338_v45  ;;  %v1655_v6 = vpack.c.bf16 %v3341_v46, %v3338_v45  ;;  %v2564_v45 = vld [vmem:[%s3542_s1 + $0x70] sm:$0xff]  }
 0x78a   : > { %v1554_v43 = vpop.f32.mrb[33].mxu1  ;;  %v2566_v46 = vld [vmem:[%s3544_s3 + $0x50] sm:$0xff]  }
 0x78b   : > { %v1555_v53 = vadd.f32 %v1554_v43, %v1449_v7  ;;  %v1556_v10 = vpop.f32.mrb[34].mxu1  ;;  %2516 = vrot.lane.b32.xlu0 %v2515_v49, %s2770_s25  ;;  %2221 = vmatmul.mubr.msk.bf16.gmra.mrb[8].mxu1 %vm589_vm3, %v2566_v46 }
 0x78c   : > { %v1558_v51 = vpop.f32.mrb[35].mxu1  ;;  %1568 = vmatprep.mubr.bf16.mxu1 %v2764_v0 }
 0x78d   : > { %v1559_v5 = vadd.f32 %v1558_v51, %v1454_v47  ;;  %v3349_v54 = vadd.f32 %v1555_v53, %v3230_v50  ;;  %v2236_v50 = vld [vmem:[%s3543_s2 + $0xe8] sm:$0xff] }
 0x78f   : > { %v3352_v1 = vadd.f32 %v1559_v5, %v3233_v41  ;;  %v2238_v41 = vld [vmem:[%s3543_s2 + $0xf8] sm:$0xff] }
 0x791   : > { %v2520_v56 = vpack.i.bf16 %v3352_v1, %v3349_v54  ;;  %v1657_v57 = vpack.c.bf16 %v3352_v1, %v3349_v54 }
 0x793   : > { %2521 = vrot.lane.b32.xlu0 %v2520_v56, %s2770_s25  ;;  %s3495_s25 = scalar_lea.hbm %s3546_s5, %s2277_s12 }
 0x797   : > { %2526 = vrot.lane.b32.xlu0 %v2515_v49, %s2769_s26 }
 0x79b   : > { %2536 = vrot.lane.b32.xlu0 %v2520_v56, %s2769_s26 }
 0x79f   : > { %1703 = vperm.xlu0 %2418, %v2236_v50  }
 0x7a3   : > { %1713 = vperm.xlu0 %2418, %v2238_v41  }
 0x7a7   : > { %1683 = vperm.xlu0 %2418, %v2232_v58  }
 0x7ab   : > { %1693 = vperm.xlu0 %2418, %v2234_v60  }
 0x7af   : > { %556 = vperm.xlu0 %2418, %v526_v61  }
 0x7b3   : > { %566 = vperm.xlu0 %2418, %v528_v63   ;;  %v2562_v63 = vld [vmem:[%s3542_s1 + $0x60] sm:$0xff]  }
 0x7b7   : > { %1008 = vperm.xlu0 %2418, %v2164_v55  }
 0x7bb   : > { %1018 = vperm.xlu0 %2418, %v2166_v52   ;;  %v1699_v52 = vpop.permute.xlu1 %1698 }
 0x7bf   : > { %1463 = vperm.xlu0 %2418, %v2212_v59  }
 0x7c3   : > { %1473 = vperm.xlu0 %2418, %v2214_v4  }
 0x7c7   : > { %1914 = vperm.xlu0 %2418, %v2260_v8  }
 0x7cb   : > { %1924 = vperm.xlu0 %2418, %v2262_v12  }
 0x7fd   : > { %v2517_v62 = vpop.permute.xlu0 %2516 }
 0x7fe   : > { %v2519_v20 = vunpack.i.h.bf16 %v2517_v62  ;;  %v2518_v22 = vunpack.i.l.bf16 %v2517_v62 }
 0x800   : > { %v1619_v23 = vsel %vm1613_vm6, %v2519_v20, %v2504_v17  ;;  %v1618_v11 = vsel %vm1613_vm6, %v2518_v22, %v2503_v18  ;;  %v1614_v13 = vsel %vm1613_vm6, %v2503_v18, %v2518_v22  ;;  %v1615_v24 = vsel %vm1613_vm6, %v2504_v17, %v2519_v20  ;;  %v1709_v17 = vpop.permute.xlu1 %1708 }
 0x801   : > { %v1646_v25 = vpack.c.bf16 %v1619_v23, %v1618_v11  ;;  %v1647_v26 = vpack.c.bf16 %v1615_v24, %v1614_v13 }
 0x803   : > { %1748 = vmatprep.subr.bf16.mxu0 %v1647_v26 }
 0x804   : > { %1749 = vmatpush1.bf16.msra.mxu0 %v1646_v25  ;;  %v1679_v25 = vpop.permute.xlu1 %1678 }
 0x805   : > { %v2522_v30 = vpop.permute.xlu0 %2521 }
 0x806   : > { %v2524_v31 = vunpack.i.h.bf16 %v2522_v30  ;;  %v2523_v32 = vunpack.i.l.bf16 %v2522_v30 }
 0x808   : > { %v1621_v35 = vsel %vm1613_vm6, %v2524_v31, %v2509_v27  ;;  %v1620_v36 = vsel %vm1613_vm6, %v2523_v32, %v2508_v28  ;;  %v1616_v37 = vsel %vm1613_vm6, %v2508_v28, %v2523_v32  ;;  %v1617_v38 = vsel %vm1613_vm6, %v2509_v27, %v2524_v31 }
 0x809   : > { %v1648_v39 = vpack.c.bf16 %v1621_v35, %v1620_v36  ;;  %v2527_v40 = vpop.permute.xlu0 %2526  ;;  %v1649_v21 = vpack.c.bf16 %v1617_v38, %v1616_v37 }
 0x80a   : > { %v2529_v3 = vunpack.i.h.bf16 %v2527_v40  ;;  %v2528_v2 = vunpack.i.l.bf16 %v2527_v40 }
 0x80b   : > { %1750 = vmatprep.subr.bf16.mxu0 %v1649_v21 }
 0x80c   : > { %v1643_v9 = vsel %vm1158_vm5, %v2529_v3, %v2514_v33  ;;  %v1642_v49 = vsel %vm1158_vm5, %v2528_v2, %v2513_v34  ;;  %1751 = vmatpush1.bf16.msra.mxu0 %v1648_v39  ;;  %v1638_v7 = vsel %vm1158_vm5, %v2513_v34, %v2528_v2  ;;  %v1639_v43 = vsel %vm1158_vm5, %v2514_v33, %v2529_v3  ;;  %v1689_v3 = vpop.permute.xlu1 %1688 }
 0x80d   : > { %v1650_v53 = vpack.c.bf16 %v1643_v9, %v1642_v49  ;;  %v2537_v10 = vpop.permute.xlu0 %2536  ;;  %v1651_v47 = vpack.c.bf16 %v1639_v43, %v1638_v7 }
 0x80e   : > { %v2539_v51 = vunpack.i.h.bf16 %v2537_v10  ;;  %v2538_v5 = vunpack.i.l.bf16 %v2537_v10 }
 0x80f   : > { %1752 = vmatprep.subr.bf16.mxu0 %v1651_v47 }
 0x810   : > { %v1645_v56 = vsel %vm1158_vm5, %v2539_v51, %v2534_v14  ;;  %v1644_v50 = vsel %vm1158_vm5, %v2538_v5, %v2533_v16  ;;  %1753 = vmatpush1.bf16.msra.mxu0 %v1650_v53  ;;  %v1640_v41 = vsel %vm1158_vm5, %v2533_v16, %v2538_v5  ;;  %v1641_v58 = vsel %vm1158_vm5, %v2534_v14, %v2539_v51 }
 0x811   : > { %v1652_v60 = vpack.c.bf16 %v1645_v56, %v1644_v50  ;;  %v1653_v61 = vpack.c.bf16 %v1641_v58, %v1640_v41 }
 0x813   : > { %1754 = vmatprep.subr.bf16.mxu0 %v1653_v61 }
 0x814   : > { %1755 = vmatpush1.bf16.msra.mxu0 %v1652_v60 }
 0x815   : > { %1756 = vmatprep.subr.bf16.mxu0 %v1655_v6  ;;  %v2567_v6 = vld [vmem:[%s3544_s3 + $0x58] sm:$0xff]  }
 0x816   : > { %2222 = vmatmul.mubr.msk.bf16.gmra.mrb[12].mxu1 %vm589_vm3, %v2567_v6 }
 0x817   : > { %1991 = vmatprep.mubr.bf16.mxu1 %v2764_v0 }
 0x818   : > { %1757 = vmatpush1.bf16.msra.mxu0 %v2771_v48 }
 0x819   : > { %1758 = vmatprep.subr.bf16.mxu0 %v1657_v57 }
 0x81c   : > { %1759 = vmatpush1.bf16.msra.mxu0 %v2771_v48  ;;  %v2565_v48 = vld [vmem:[%s3542_s1 + $0x78] sm:$0xff]  }
 0x81e   : > { %v1704_v8 = vpop.permute.xlu0 %1703 }
 0x81f   : > { %2243 = vmatmul.mubr.msk.bf16.vlgmr.msra.gmra.mrb[44].mxu0 %vm375_vm2, %v2562_v63 }
 0x820   : > { %1790 = vmatprep.mubr.bf16.mxu0 %v2764_v0 }
 0x822   : > { %v1714_v18 = vpop.permute.xlu0 %1713 }
 0x826   : > { %v1684_v30 = vpop.permute.xlu0 %1683 }
 0x827   : > { %2244 = vmatmul.mubr.msk.bf16.gmra.mrb[48].mxu0 %vm375_vm2, %v2563_v42 }
 0x828   : > { %1800 = vmatprep.mubr.bf16.mxu0 %v2764_v0 }
 0x82a   : > { %v1694_v49 = vpop.permute.xlu0 %1693 }
 0x82f   : > { %2245 = vmatmul.mubr.msk.bf16.gmra.mrb[52].mxu0 %vm375_vm2, %v2564_v45 }
 0x830   : > { %1810 = vmatprep.mubr.bf16.mxu0 %v2764_v0 }
 0x837   : > { %2246 = vmatmul.mubr.msk.bf16.gmra.mrb[56].mxu0 %vm375_vm2, %v2565_v48 }
 0x8f2   : > { %v1782_v54 = vpop.f32.mrb[44].mxu0 }
 0x8f3   : > { %v1784_v1 = vpop.f32.mrb[45].mxu0  ;;  %v1783_v28 = vadd.f32 %v1782_v54, %v1679_v25 }
 0x8f4   : > { %v1786_v57 = vpop.f32.mrb[46].mxu0  ;;  %v1785_v31 = vadd.f32 %v1784_v1, %v1679_v25 }
 0x8f5   : > { %v1788_v55 = vpop.f32.mrb[47].mxu0  ;;  %v1787_v33 = vadd.f32 %v1786_v57, %v1684_v30 }
 0x8f6   : > { %v1789_v34 = vadd.f32 %v1788_v55, %v1684_v30 }
 0x8fa   : > { %v1792_v59 = vpop.f32.mrb[48].mxu0 }
 0x8fb   : > { %v1794_v4 = vpop.f32.mrb[49].mxu0  ;;  %v1793_v16 = vadd.f32 %v1792_v59, %v1689_v3 }
 0x8fc   : > { %v1796_v12 = vpop.f32.mrb[50].mxu0  ;;  %v1795_v7 = vadd.f32 %v1794_v4, %v1689_v3 }
 0x8fd   : > { %v1798_v15 = vpop.f32.mrb[51].mxu0  ;;  %v1797_v10 = vadd.f32 %v1796_v12, %v1694_v49 }
 0x8fe   : > { %v1799_v51 = vadd.f32 %v1798_v15, %v1694_v49 }
 0x902   : > { %v1802_v62 = vpop.f32.mrb[52].mxu0 }
 0x903   : > { %v1803_v19 = vadd.f32 %v1802_v62, %v1699_v52  ;;  %v1804_v20 = vpop.f32.mrb[53].mxu0 }
 0x904   : > { %v1805_v22 = vadd.f32 %v1804_v20, %v1699_v52  ;;  %v1806_v23 = vpop.f32.mrb[54].mxu0 }
 0x905   : > { %v1829_v11 = vmul.f32 0.5, %v1803_v19  ;;  %v1807_v13 = vadd.f32 %v1806_v23, %v1704_v8  ;;  %v1808_v24 = vpop.f32.mrb[55].mxu0 }
 0x906   : > { %v1830_v26 = vmul.f32 0.5, %v1805_v22  ;;  %v1809_v27 = vadd.f32 %v1808_v24, %v1704_v8 }
 0x907   : > { %2668 = vtanh.f32 %v1829_v11  ;;  %v1831_v29 = vmul.f32 0.5, %v1807_v13 }
 0x908   : > { %2670 = vtanh.f32 %v1830_v26  ;;  %v1832_v32 = vmul.f32 0.5, %v1809_v27 }
 0x909   : > { %2672 = vtanh.f32 %v1831_v29 }
 0x90a   : > { %2674 = vtanh.f32 %v1832_v32  ;;  %v1812_v35 = vpop.f32.mrb[56].mxu0 }
 0x90b   : > { %2676 = vtanh.f32 %v1783_v28  ;;  %v1813_v36 = vadd.f32 %v1812_v35, %v1709_v17  ;;  %v1814_v37 = vpop.f32.mrb[57].mxu0  ;;  %v2569_v35 = vld [vmem:[%s3544_s3 + $0x68] sm:$0xff]  }
 0x90c   : > { %2678 = vtanh.f32 %v1785_v31  ;;  %v1815_v38 = vadd.f32 %v1814_v37, %v1709_v17  ;;  %v1816_v39 = vpop.f32.mrb[58].mxu0  ;;  %v2571_v37 = vld [vmem:[%s3544_s3 + $0x78] sm:$0xff]  }
 0x90d   : > { %2680 = vtanh.f32 %v1787_v33  ;;  %v1833_v40 = vmul.f32 0.5, %v1813_v36  ;;  %v1817_v21 = vadd.f32 %v1816_v39, %v1714_v18  ;;  %v1818_v44 = vpop.f32.mrb[59].mxu0  ;;  %v2570_v36 = vld [vmem:[%s3544_s3 + $0x70] sm:$0xff]   ;;  %v557_v39 = vpop.permute.xlu0 %556 }
 0x90e   : > { %2682 = vtanh.f32 %v1789_v34  ;;  %v1834_v2 = vmul.f32 0.5, %v1815_v38  ;;  %v1819_v14 = vadd.f32 %v1818_v44, %v1714_v18  ;;  %v2568_v34 = vld [vmem:[%s3544_s3 + $0x60] sm:$0xff]   ;;  %v552_v38 = vpop.permute.xlu1 %551 }
 0x90f   : > { %2684 = vtanh.f32 %v1833_v40  ;;  %v1835_v9 = vmul.f32 0.5, %v1817_v21 }
 0x910   : > { %2686 = vtanh.f32 %v1834_v2  ;;  %v1836_v43 = vmul.f32 0.5, %v1819_v14 }
 0x911   : > { %v2669_v53 = vpop.eup %2668  ;;  %2688 = vtanh.f32 %v1835_v9  ;;  %v567_v21 = vpop.permute.xlu0 %566 }
 0x912   : > { %v2671_v47 = vpop.eup %2670  ;;  %v1845_v5 = vadd.f32 1.0, %v2669_v53  ;;  %2690 = vtanh.f32 %v1836_v43  ;;  %v562_v40 = vpop.permute.xlu1 %561 }
 0x913   : > { %v2673_v56 = vpop.eup %2672  ;;  %2692 = vtanh.f32 %v1793_v16  ;;  %v1846_v50 = vadd.f32 1.0, %v2671_v47 }
 0x914   : > { %v2675_v41 = vpop.eup %2674  ;;  %2694 = vtanh.f32 %v1795_v7  ;;  %v1853_v58 = vmul.f32 0.5, %v1845_v5  ;;  %v1847_v60 = vadd.f32 1.0, %v2673_v56 }
 0x915   : > { %v2677_v61 = vpop.eup %2676  ;;  %2696 = vtanh.f32 %v1797_v10  ;;  %v1854_v63 = vmul.f32 0.5, %v1846_v50  ;;  %v1848_v42 = vadd.f32 1.0, %v2675_v41  ;;  %v1009_v3 = vpop.permute.xlu0 %1008 }
 0x916   : > { %v2679_v45 = vpop.eup %2678  ;;  %2698 = vtanh.f32 %v1799_v51  ;;  %v1861_v48 = vmul.f32 %v2677_v61, %v1853_v58  ;;  %v1855_v46 = vmul.f32 0.5, %v1847_v60  ;;  %v1004_v44 = vpop.permute.xlu1 %1003  ;;  %v2294_v58 = vadd.f32 %v1009_v3, %v557_v39 }
 0x917   : > { %v2681_v6 = vpop.eup %2680  ;;  %v1856_v54 = vmul.f32 0.5, %v1848_v42  ;;  %v1862_v1 = vmul.f32 %v2679_v45, %v1854_v63  ;;  %v2290_v53 = vadd.f32 %v1004_v44, %v552_v38 }
 0x918   : > { %v2683_v57 = vpop.eup %2682  ;;  %v1863_v55 = vmul.f32 %v2681_v6, %v1855_v46 }
 0x919   : > { %v2685_v52 = vpop.eup %2684  ;;  %v1864_v59 = vmul.f32 %v2683_v57, %v1856_v54  ;;  %v1019_v14 = vpop.permute.xlu0 %1018 }
 0x91a   : > { %v2687_v4 = vpop.eup %2686  ;;  %v1849_v8 = vadd.f32 1.0, %v2685_v52  ;;  %v1878_v12 = vpack.c.bf16 %v1863_v55, %v1861_v48  ;;  %v1014_v2 = vpop.permute.xlu1 %1013 }
 0x91b   : > { %v2689_v15 = vpop.eup %2688  ;;  %v1850_v17 = vadd.f32 1.0, %v2687_v4  ;;  %v1879_v18 = vpack.c.bf16 %v1864_v59, %v1862_v1  ;;  %v2298_v63 = vadd.f32 %v1014_v2, %v562_v40  ;;  %v2302_v4 = vadd.f32 %v1019_v14, %v567_v21 }
 0x91c   : > { %v2691_v62 = vpop.eup %2690  ;;  %v1857_v19 = vmul.f32 0.5, %v1849_v8  ;;  %v1851_v20 = vadd.f32 1.0, %v2689_v15 }
 0x91d   : > { %v2693_v22 = vpop.eup %2692  ;;  %v1858_v23 = vmul.f32 0.5, %v1850_v17  ;;  %v1852_v11 = vadd.f32 1.0, %v2691_v62  ;;  %1959 = vmatprep.subr.bf16.mxu1 %v1879_v18  ;;  %v1464_v7 = vpop.permute.xlu0 %1463 }
 0x91e   : > { %v2695_v13 = vpop.eup %2694  ;;  %v1865_v24 = vmul.f32 %v2693_v22, %v1857_v19  ;;  %v1859_v25 = vmul.f32 0.5, %v1851_v20  ;;  %1960 = vmatpush1.bf16.msra.mxu1 %v1878_v12  ;;  %v1459_v49 = vpop.permute.xlu1 %1458  ;;  %v2295_v45 = vadd.f32 %v2294_v58, %v1464_v7 }
 0x91f   : > { %v2697_v26 = vpop.eup %2696  ;;  %v1860_v27 = vmul.f32 0.5, %v1852_v11  ;;  %v1866_v28 = vmul.f32 %v2695_v13, %v1858_v23  ;;  %v2291_v41 = vadd.f32 %v2290_v53, %v1459_v49 }
 0x920   : > { %v2699_v29 = vpop.eup %2698  ;;  %v1867_v30 = vmul.f32 %v2697_v26, %v1859_v25 }
 0x921   : > { %v1868_v31 = vmul.f32 %v2699_v29, %v1860_v27  ;;  %v1474_v51 = vpop.permute.xlu0 %1473 }
 0x922   : > { %v1880_v32 = vpack.c.bf16 %v1867_v30, %v1865_v24  ;;  %v1469_v10 = vpop.permute.xlu1 %1468  ;;  %v2303_v15 = vadd.f32 %v2302_v4, %v1474_v51 }
 0x923   : > { %v1881_v33 = vpack.c.bf16 %v1868_v31, %v1866_v28  ;;  %v2299_v55 = vadd.f32 %v2298_v63, %v1469_v10 }
 0x925   : > { %1961 = vmatprep.subr.bf16.mxu1 %v1881_v33  ;;  %v1915_v61 = vpop.permute.xlu0 %1914 }
 0x926   : > { %1962 = vmatpush1.bf16.msra.mxu1 %v1880_v32  ;;  %v1910_v60 = vpop.permute.xlu1 %1909  ;;  %v2296_v6 = vadd.f32 %v2295_v45, %v1915_v61 }
 0x927   : > { %v2292_v42 = vadd.f32 %v2291_v41, %v1910_v60 }
 0x929   : > { %2267 = vmatmul.mubr.msk.bf16.vlgmr.msra.gmra.mrb[36].mxu1 %vm589_vm3, %v2568_v34  ;;  %v1925_v8 = vpop.permute.xlu0 %1924 }
 0x92a   : > { %1997 = vmatprep.mubr.bf16.mxu1 %v2764_v0  ;;  %v1920_v59 = vpop.permute.xlu1 %1919  ;;  %v2304_v62 = vadd.f32 %v2303_v15, %v1925_v8 }
 0x92b   : > { %v2300_v12 = vadd.f32 %v2299_v55, %v1920_v59 }
 0x931   : > { %2268 = vmatmul.mubr.msk.bf16.gmra.mrb[40].mxu1 %vm589_vm3, %v2569_v35 }
 0x932   : > { %2003 = vmatprep.mubr.bf16.mxu1 %v2764_v0 }
 0x939   : > { %2269 = vmatmul.mubr.msk.bf16.gmra.mrb[8].mxu1 %vm589_vm3, %v2570_v36 }
 0x93a   : > { %2011 = vmatprep.mubr.bf16.mxu1 %v2764_v0 }
 0x941   : > { %2270 = vmatmul.mubr.msk.bf16.gmra.mrb[12].mxu1 %vm589_vm3, %v2571_v37 }
 0x9fc   : > { %v1993_v16 = vpop.f32.mrb[36].mxu1 }
 0x9fd   : > { %v1994_v9 = vpop.f32.mrb[37].mxu1 }
 0x9fe   : > { %v1995_v0 = vpop.f32.mrb[38].mxu1 }
 0x9ff   : > { %v1996_v43 = vpop.f32.mrb[39].mxu1 }
 0xa04   : > { %v1999_v47 = vpop.f32.mrb[40].mxu1 }
 0xa05   : > { %v2000_v5 = vpop.f32.mrb[41].mxu1 }
 0xa06   : > { %v2001_v56 = vpop.f32.mrb[42].mxu1 }
 0xa07   : > { %v2002_v50 = vpop.f32.mrb[43].mxu1 }
 0xa0c   : > { %v2005_v48 = vpop.f32.mrb[8].mxu1 }
 0xa0d   : > { %v2006_v46 = vpop.f32.mrb[9].mxu1 }
 0xa0e   : > { %v2293_v54 = vadd.f32 %v2292_v42, %v2006_v46  ;;  %v2008_v1 = vpop.f32.mrb[10].mxu1 }
 0xa0f   : > { %v2009_v57 = vpop.f32.mrb[11].mxu1 }
 0xa10   : > { %2024 = vst [vmem:[%s217_s9] sm:$0xff] %v2293_v54  ;;  %v2297_v52 = vadd.f32 %v2296_v6, %v2009_v57 }
 0xa12   : > { %2025 = vst [vmem:[%s217_s9 + $0x8] sm:$0xff] %v2297_v52 }
 0xa14   : > { %v2013_v17 = vpop.f32.mrb[12].mxu1 }
 0xa15   : > { %v2014_v18 = vpop.f32.mrb[13].mxu1 }
 0xa16   : > { %v2301_v19 = vadd.f32 %v2300_v12, %v2014_v18  ;;  %v2016_v20 = vpop.f32.mrb[14].mxu1 }
 0xa17   : > { %v2017_v22 = vpop.f32.mrb[15].mxu1 }
 0xa18   : > { %2026 = vst [vmem:[%s217_s9 + $0x10] sm:$0xff] %v2301_v19  ;;  %v2305_v23 = vadd.f32 %v2304_v62, %v2017_v22 }
 0xa1a   : > { %2027 = vst [vmem:[%s217_s9 + $0x18] sm:$0xff] %v2305_v23 }
 0xa1b   : > { %2713 = shalt.err (!%p2710_p3)
}
 0xa1c   : > { %s2714_s23 = scalar_lea.hbm %s3495_s25, 512  ;;  %s2718_s6 = scalar_lea.hbm %s3546_s5, 1024 }
 0xa1d   : > { %p2715_p4 = scmp.ne.s32.totalorder %s3495_s25, %s2714_s23  ;;  %p2719_p9 = scmp.lt.u32.totalorder %s3495_s25, %s3546_s5 }
 0xa1e   : > { %p2720_p10 = scmp.lt.u32.totalorder %s2718_s6, %s2714_s23  ;;  %p2722_p12 = scmp.lt.u32.totalorder %s2714_s23, %s3495_s25 }
 0xa1f   : > { %p2716_p7 = pnand %p2715_p4, %p2842_p5 }
 0xa20   : > { %p2721_p11 = por %p2720_p10, %p2719_p9 }
 0xa21   : > { %p2717_p8 = pneg %p2716_p7 }
 0xa22   : > { %p2723_p13 = por %p2722_p12, %p2721_p11 }
 0xa24   : > { %p2724_p0 = pnand %p2723_p13, %p2717_p8 }
 0xa26   : > { %2727 = shalt.err (!%p2724_p0)
}
 0xa27   : > { %s2773_s12 = smov 128  }
 0xa28   : > { %2330 = dma.vmem_to_hbm [thread:$0]  (%p2842_p5), %s3490_s11, 512, %s3495_s25, %s3499_s15, %s2773_s12, %s2773_s12, %s2769_s26  }
 0xa29 PF: > { %p2336_p1 = scmp.ge.s32.totalorder %s2762_s21, 2  ;;  %s2057_s13 = sand.u32 1, %s2750_s18  }
 0xa2a   : > { %s2058_s14 = scalar_lea.sflag [#allocation3], %s2057_s13 }
 0xa2b   : > { %p2333_p2 = pnand %p2336_p1, %p2846_p6 }
 0xa2d   : > { %2745 = dma.done.wait (!%p2333_p2), %s2058_s14, 512  }
 0xa2e   : > { %2747 = vsyncadd (!%p2333_p2), %s2058_s14, 4294966784  ;;  %p15_p3 = scmp.ge.s32.totalorder %s2829_s24, 4   ;;  %s3549_s18 = smov %s2754_s19 }
 0xa2f   : > { %s3550_s19 = smov %s2758_s20  ;;  %s3551_s20 = smov %s2840_s27 }
 0xa30   : > { %s3552_s21 = smov %s2829_s24  ;;  %17 = sbr.rel (!%p15_p3) target bundleno = 3 (0x3), region = 87 }
 0xa37   :  { %2063 = vsyncpa [#allocation3], 1 }
 0xa38   :  { %2065 = vsyncpa [#allocation3 + $0x1], 1 }

</bundles_post_ra>
